<compile_context>
chip_gen: v5e
topology: v5e:2x2
jax: 0.10.0
libtpu: 0.0.40
codegen_flags: <defaults>
</compile_context>

<pallas_src>
import jax
import jax.numpy as jnp
import numpy as np
from jax import lax
from jax.experimental import pallas as pl
from jax.experimental.pallas import tpu as pltpu


# ----------------------------- Pallas kernel -----------------------------
def gru_kernel(x_ref, wih_ref, whh_ref, bih_ref, bhh_ref, h0_ref,
               hid_ref, hn_ref):
    """Whole GRU forward in one invocation.

    Refs (VMEM, full arrays):
      x_ref   : (nb, seq, I)   input sequence (batch_first)
      wih_ref : (I, 3H)        fused input->hidden weights (transposed), cols r|z|n
      whh_ref : (H, 3H)        fused hidden->hidden weights (transposed), cols r|z|n
      bih_ref : (1, 3H)        fused input biases
      bhh_ref : (1, 3H)        fused hidden biases
      h0_ref  : (nb, H)        initial hidden state
      hid_ref : (nb, seq, H)   all hidden states (resident block, one HBM writeback)
      hn_ref  : (nb, H)        final hidden state (written once)
    """
    nb, seq, I = x_ref.shape
    H = h0_ref.shape[-1]

    # --- Input projection for ALL time steps / all 3 gates in one MXU pass ---
    # (nb*seq, I) @ (I, 3H) -> reshape back to (nb, seq, 3H).  Operands stay in
    # their native dtype; accumulation is f32.
    x_all = x_ref[...].reshape(nb * seq, I)
    gi_all = (jnp.dot(x_all, wih_ref[...], preferred_element_type=jnp.float32)
              + bih_ref[...].astype(jnp.float32))
    gi_all = gi_all.reshape(nb, seq, 3 * H)

    bhh = bhh_ref[...].astype(jnp.float32)            # (1, 3H)
    whh = whh_ref[...]                                # (H, 3H), native dtype
    w_dtype = whh.dtype

    h = h0_ref[...].astype(jnp.float32)               # (nb, H) f32 carry

    # --- Sequential recurrence: one fused (nb, H) @ (H, 3H) matmul per step ---
    # seq is a small static constant, so a fully-unrolled static loop keeps all
    # slice indices static (no dynamic sublane indexing needed).
    for t in range(seq):
        gi_t = gi_all[:, t, :]                                        # (nb, 3H)
        gh = jnp.dot(h.astype(w_dtype), whh,
                     preferred_element_type=jnp.float32) + bhh        # (nb, 3H)

        r = jax.nn.sigmoid(gi_t[:, :H] + gh[:, :H])
        z = jax.nn.sigmoid(gi_t[:, H:2 * H] + gh[:, H:2 * H])
        n = jnp.tanh(gi_t[:, 2 * H:] + r * gh[:, 2 * H:])
        h = (1.0 - z) * n + z * h

        hid_ref[:, t, :] = h.astype(hid_ref.dtype)    # VMEM store into resident block

    hn_ref[...] = h.astype(hn_ref.dtype)              # final state, written once


# ------------------------------ JAX wrapper -------------------------------
@jax.jit
def gru_decoder_forward(x, wih_all, whh_all, bih, bhh, state):
    """x: [nb, seq, I]; state: [1, nb, H].  Returns (hidden [nb,seq,H], next_state [1,nb,H])."""
    nb, seq, I = x.shape
    H = whh_all.shape[0]
    h0 = state[0]                                     # (nb, H)

    hidden, h_last = pl.pallas_call(
        gru_kernel,
        out_shape=(
            jax.ShapeDtypeStruct((nb, seq, H), x.dtype),
            jax.ShapeDtypeStruct((nb, H), x.dtype),
        ),
        grid_spec=pltpu.PrefetchScalarGridSpec(
            num_scalar_prefetch=0,
            grid=(1,),                                # single invocation; recurrence in-kernel
            in_specs=[
                pl.BlockSpec((nb, seq, I), lambda i: (0, 0, 0)),   # x (full)
                pl.BlockSpec((I, 3 * H), lambda i: (0, 0)),        # W_ih^T fused
                pl.BlockSpec((H, 3 * H), lambda i: (0, 0)),        # W_hh^T fused
                pl.BlockSpec((1, 3 * H), lambda i: (0, 0)),        # b_ih fused
                pl.BlockSpec((1, 3 * H), lambda i: (0, 0)),        # b_hh fused
                pl.BlockSpec((nb, H), lambda i: (0, 0)),           # h0
            ],
            out_specs=[
                pl.BlockSpec((nb, seq, H), lambda i: (0, 0, 0)),   # hidden (full)
                pl.BlockSpec((nb, H), lambda i: (0, 0)),           # final state
            ],
        ),
        compiler_params=pltpu.CompilerParams(
            dimension_semantics=("arbitrary",),
        ),
    )(x, wih_all, whh_all, bih, bhh, h0)

    return hidden, h_last[None]                        # next_state: [1, nb, H]


# --------------------------- reference (pure JAX) --------------------------
def gru_reference(x, wih_all, whh_all, bih, bhh, state):
    H = whh_all.shape[0]
    h0 = state[0]

    def step(h, x_t):
        gi = x_t @ wih_all + bih[0]
        gh = h @ whh_all + bhh[0]
        r = jax.nn.sigmoid(gi[:, :H] + gh[:, :H])
        z = jax.nn.sigmoid(gi[:, H:2 * H] + gh[:, H:2 * H])
        n = jnp.tanh(gi[:, 2 * H:] + r * gh[:, 2 * H:])
        h_new = (1.0 - z) * n + z * h
        return h_new, h_new

    h_last, hs = lax.scan(step, h0, jnp.transpose(x, (1, 0, 2)))
    return jnp.transpose(hs, (1, 0, 2)), h_last[None]


# --------------------------------- main ------------------------------------
if __name__ == "__main__":
    nb, seq, input_size, hidden_size = 2, 8, 16, 32
    key = jax.random.PRNGKey(0)
    k = jax.random.split(key, 6)

    # Deterministic parameter init, matching nn.GRU shapes:
    #   weight_ih_l0: [3H, I], weight_hh_l0: [3H, H], bias_ih_l0: [3H], bias_hh_l0: [3H]
    # (rows stacked in PyTorch gate order r, z, n)
    bound = 1.0 / np.sqrt(hidden_size)
    weight_ih = jax.random.uniform(k[0], (3 * hidden_size, input_size), jnp.float32, -bound, bound)
    weight_hh = jax.random.uniform(k[1], (3 * hidden_size, hidden_size), jnp.float32, -bound, bound)
    bias_ih = jax.random.uniform(k[2], (3 * hidden_size,), jnp.float32, -bound, bound)
    bias_hh = jax.random.uniform(k[3], (3 * hidden_size,), jnp.float32, -bound, bound)

    # Repack fused for the kernel: W^T with columns [r | z | n], biases as (1, 3H).
    wih_all = jnp.transpose(weight_ih)                 # (I, 3H)
    whh_all = jnp.transpose(weight_hh)                 # (H, 3H)
    bih = bias_ih.reshape(1, 3 * hidden_size)          # (1, 3H)
    bhh = bias_hh.reshape(1, 3 * hidden_size)          # (1, 3H)

    # Inputs: x [nb, seq, input_size]; optional initial state [1, nb, H] (None -> zeros).
    x = jax.random.normal(k[4], (nb, seq, input_size), jnp.float32)
    state = jax.random.normal(k[5], (1, nb, hidden_size), jnp.float32)

    hidden, next_state = gru_decoder_forward(x, wih_all, whh_all, bih, bhh, state)
    jax.block_until_ready((hidden, next_state))

    # Also exercise the "state is None" path (zeros initial state, PyTorch default).
    zeros_state = jnp.zeros((1, nb, hidden_size), jnp.float32)
    hidden0, next_state0 = gru_decoder_forward(x, wih_all, whh_all, bih, bhh, zeros_state)
    jax.block_until_ready((hidden0, next_state0))

    # Correctness check against a pure-JAX scan reference.
    ref_hidden, ref_next = gru_reference(x, wih_all, whh_all, bih, bhh, state)
    ref_hidden0, ref_next0 = gru_reference(x, wih_all, whh_all, bih, bhh, zeros_state)
    assert hidden.shape == (nb, seq, hidden_size)
    assert next_state.shape == (1, nb, hidden_size)
    np.testing.assert_allclose(np.asarray(hidden), np.asarray(ref_hidden), rtol=1e-5, atol=1e-5)
    np.testing.assert_allclose(np.asarray(next_state), np.asarray(ref_next), rtol=1e-5, atol=1e-5)
    np.testing.assert_allclose(np.asarray(hidden0), np.asarray(ref_hidden0), rtol=1e-5, atol=1e-5)
    np.testing.assert_allclose(np.asarray(next_state0), np.asarray(ref_next0), rtol=1e-5, atol=1e-5)

    print("KERNEL_OK")
</pallas_src>

<mosaic_0001>
module attributes {stable_mosaic.version = 11 : i64} {
  func.func @gru_kernel(%arg0: i32, %arg1: memref<2x8x16xf32, #tpu.memory_space<vmem>>, %arg2: memref<16x96xf32, #tpu.memory_space<vmem>>, %arg3: memref<32x96xf32, #tpu.memory_space<vmem>>, %arg4: memref<1x96xf32, #tpu.memory_space<vmem>>, %arg5: memref<1x96xf32, #tpu.memory_space<vmem>>, %arg6: memref<2x32xf32, #tpu.memory_space<vmem>>, %arg7: memref<2x8x32xf32, #tpu.memory_space<vmem>>, %arg8: memref<2x32xf32, #tpu.memory_space<vmem>>) attributes {dimension_semantics = [#tpu.dimension_semantics<arbitrary>], iteration_bounds = array<i64: 1>, scalar_prefetch = 0 : i64, scratch_operands = 0 : i64, tpu.core_type = #tpu.core_type<tc>, window_params = [{pipeline_mode = #tpu.pipeline_mode<synchronous>, transform_indices = @transform_0, window_bounds = array<i64: 2, 8, 16>}, {pipeline_mode = #tpu.pipeline_mode<synchronous>, transform_indices = @transform_1, window_bounds = array<i64: 16, 96>}, {pipeline_mode = #tpu.pipeline_mode<synchronous>, transform_indices = @transform_2, window_bounds = array<i64: 32, 96>}, {pipeline_mode = #tpu.pipeline_mode<synchronous>, transform_indices = @transform_3, window_bounds = array<i64: 1, 96>}, {pipeline_mode = #tpu.pipeline_mode<synchronous>, transform_indices = @transform_4, window_bounds = array<i64: 1, 96>}, {pipeline_mode = #tpu.pipeline_mode<synchronous>, transform_indices = @transform_5, window_bounds = array<i64: 2, 32>}, {pipeline_mode = #tpu.pipeline_mode<synchronous>, transform_indices = @transform_6, window_bounds = array<i64: 2, 8, 32>}, {pipeline_mode = #tpu.pipeline_mode<synchronous>, transform_indices = @transform_7, window_bounds = array<i64: 2, 32>}]} {
    %c0 = arith.constant 0 : index
    %c0_0 = arith.constant 0 : index
    %c0_1 = arith.constant 0 : index
    %0 = vector.load %arg1[%c0, %c0_0, %c0_1] : memref<2x8x16xf32, #tpu.memory_space<vmem>>, vector<2x8x16xf32>
    %1 = vector.shape_cast %0 : vector<2x8x16xf32> to vector<16x16xf32>
    %c0_2 = arith.constant 0 : index
    %c0_3 = arith.constant 0 : index
    %2 = vector.load %arg2[%c0_2, %c0_3] : memref<16x96xf32, #tpu.memory_space<vmem>>, vector<16x96xf32>
    %cst = arith.constant dense<0.000000e+00> : vector<16x96xf32>
    %3 = tpu.matmul %1, %2, %cst {dimension_numbers = #tpu.dot_dimension_numbers<[1], [0], [0], [1], [0, 0, 1, 1], [], []>} : vector<16x16xf32>, vector<16x96xf32>, vector<16x96xf32> -> vector<16x96xf32>
    %c0_4 = arith.constant 0 : index
    %c0_5 = arith.constant 0 : index
    %4 = vector.load %arg4[%c0_4, %c0_5] : memref<1x96xf32, #tpu.memory_space<vmem>>, vector<1x96xf32>
    %5 = vector.broadcast %4 : vector<1x96xf32> to vector<16x96xf32>
    %6 = arith.addf %3, %5 : vector<16x96xf32>
    %7 = vector.shape_cast %6 : vector<16x96xf32> to vector<2x8x96xf32>
    %c0_6 = arith.constant 0 : index
    %c0_7 = arith.constant 0 : index
    %8 = vector.load %arg5[%c0_6, %c0_7] : memref<1x96xf32, #tpu.memory_space<vmem>>, vector<1x96xf32>
    %c0_8 = arith.constant 0 : index
    %c0_9 = arith.constant 0 : index
    %9 = vector.load %arg3[%c0_8, %c0_9] : memref<32x96xf32, #tpu.memory_space<vmem>>, vector<32x96xf32>
    %c0_10 = arith.constant 0 : index
    %c0_11 = arith.constant 0 : index
    %10 = vector.load %arg6[%c0_10, %c0_11] : memref<2x32xf32, #tpu.memory_space<vmem>>, vector<2x32xf32>
    %11 = vector.extract_strided_slice %7 {offsets = [0, 0, 0], sizes = [2, 1, 96], strides = [1, 1, 1]} : vector<2x8x96xf32> to vector<2x1x96xf32>
    %12 = vector.shape_cast %11 : vector<2x1x96xf32> to vector<2x96xf32>
    %cst_12 = arith.constant dense<0.000000e+00> : vector<2x96xf32>
    %13 = tpu.matmul %10, %9, %cst_12 {dimension_numbers = #tpu.dot_dimension_numbers<[1], [0], [0], [1], [0, 0, 1, 1], [], []>} : vector<2x32xf32>, vector<32x96xf32>, vector<2x96xf32> -> vector<2x96xf32>
    %14 = vector.broadcast %8 : vector<1x96xf32> to vector<2x96xf32>
    %15 = arith.addf %13, %14 : vector<2x96xf32>
    %16 = vector.extract_strided_slice %12 {offsets = [0, 0], sizes = [2, 32], strides = [1, 1]} : vector<2x96xf32> to vector<2x32xf32>
    %17 = vector.extract_strided_slice %15 {offsets = [0, 0], sizes = [2, 32], strides = [1, 1]} : vector<2x96xf32> to vector<2x32xf32>
    %18 = arith.addf %16, %17 : vector<2x32xf32>
    %19 = arith.negf %18 : vector<2x32xf32>
    %20 = math.exp %19 : vector<2x32xf32>
    %cst_13 = arith.constant 1.000000e+00 : f32
    %21 = vector.broadcast %cst_13 : f32 to vector<2x32xf32>
    %22 = arith.addf %21, %20 : vector<2x32xf32>
    %23 = arith.divf %21, %22 : vector<2x32xf32>
    %24 = vector.extract_strided_slice %12 {offsets = [0, 32], sizes = [2, 32], strides = [1, 1]} : vector<2x96xf32> to vector<2x32xf32>
    %25 = vector.extract_strided_slice %15 {offsets = [0, 32], sizes = [2, 32], strides = [1, 1]} : vector<2x96xf32> to vector<2x32xf32>
    %26 = arith.addf %24, %25 : vector<2x32xf32>
    %27 = arith.negf %26 : vector<2x32xf32>
    %28 = math.exp %27 : vector<2x32xf32>
    %cst_14 = arith.constant 1.000000e+00 : f32
    %29 = vector.broadcast %cst_14 : f32 to vector<2x32xf32>
    %30 = arith.addf %29, %28 : vector<2x32xf32>
    %31 = arith.divf %29, %30 : vector<2x32xf32>
    %32 = vector.extract_strided_slice %12 {offsets = [0, 64], sizes = [2, 32], strides = [1, 1]} : vector<2x96xf32> to vector<2x32xf32>
    %33 = vector.extract_strided_slice %15 {offsets = [0, 64], sizes = [2, 32], strides = [1, 1]} : vector<2x96xf32> to vector<2x32xf32>
    %34 = arith.mulf %23, %33 : vector<2x32xf32>
    %35 = arith.addf %32, %34 : vector<2x32xf32>
    %36 = math.tanh %35 : vector<2x32xf32>
    %cst_15 = arith.constant 1.000000e+00 : f32
    %37 = vector.broadcast %cst_15 : f32 to vector<2x32xf32>
    %38 = arith.subf %37, %31 : vector<2x32xf32>
    %39 = arith.mulf %38, %36 : vector<2x32xf32>
    %40 = arith.mulf %31, %10 : vector<2x32xf32>
    %41 = arith.addf %39, %40 : vector<2x32xf32>
    %c0_16 = arith.constant 0 : index
    %c0_17 = arith.constant 0 : index
    %c0_18 = arith.constant 0 : index
    %42 = vector.load %arg7[%c0_16, %c0_17, %c0_18] : memref<2x8x32xf32, #tpu.memory_space<vmem>>, vector<2x1x32xf32>
    %43 = vector.shape_cast %42 : vector<2x1x32xf32> to vector<2x32xf32>
    %44 = vector.shape_cast %41 : vector<2x32xf32> to vector<2x1x32xf32>
    tpu.vector_store %arg7[%c0_16, %c0_17, %c0_18], %44 {strides = array<i32>} : memref<2x8x32xf32, #tpu.memory_space<vmem>>, vector<2x1x32xf32>,
    %45 = vector.extract_strided_slice %7 {offsets = [0, 1, 0], sizes = [2, 1, 96], strides = [1, 1, 1]} : vector<2x8x96xf32> to vector<2x1x96xf32>
    %46 = vector.shape_cast %45 : vector<2x1x96xf32> to vector<2x96xf32>
    %cst_19 = arith.constant dense<0.000000e+00> : vector<2x96xf32>
    %47 = tpu.matmul %41, %9, %cst_19 {dimension_numbers = #tpu.dot_dimension_numbers<[1], [0], [0], [1], [0, 0, 1, 1], [], []>} : vector<2x32xf32>, vector<32x96xf32>, vector<2x96xf32> -> vector<2x96xf32>
    %48 = vector.broadcast %8 : vector<1x96xf32> to vector<2x96xf32>
    %49 = arith.addf %47, %48 : vector<2x96xf32>
    %50 = vector.extract_strided_slice %46 {offsets = [0, 0], sizes = [2, 32], strides = [1, 1]} : vector<2x96xf32> to vector<2x32xf32>
    %51 = vector.extract_strided_slice %49 {offsets = [0, 0], sizes = [2, 32], strides = [1, 1]} : vector<2x96xf32> to vector<2x32xf32>
    %52 = arith.addf %50, %51 : vector<2x32xf32>
    %53 = arith.negf %52 : vector<2x32xf32>
    %54 = math.exp %53 : vector<2x32xf32>
    %cst_20 = arith.constant 1.000000e+00 : f32
    %55 = vector.broadcast %cst_20 : f32 to vector<2x32xf32>
    %56 = arith.addf %55, %54 : vector<2x32xf32>
    %57 = arith.divf %55, %56 : vector<2x32xf32>
    %58 = vector.extract_strided_slice %46 {offsets = [0, 32], sizes = [2, 32], strides = [1, 1]} : vector<2x96xf32> to vector<2x32xf32>
    %59 = vector.extract_strided_slice %49 {offsets = [0, 32], sizes = [2, 32], strides = [1, 1]} : vector<2x96xf32> to vector<2x32xf32>
    %60 = arith.addf %58, %59 : vector<2x32xf32>
    %61 = arith.negf %60 : vector<2x32xf32>
    %62 = math.exp %61 : vector<2x32xf32>
    %cst_21 = arith.constant 1.000000e+00 : f32
    %63 = vector.broadcast %cst_21 : f32 to vector<2x32xf32>
    %64 = arith.addf %63, %62 : vector<2x32xf32>
    %65 = arith.divf %63, %64 : vector<2x32xf32>
    %66 = vector.extract_strided_slice %46 {offsets = [0, 64], sizes = [2, 32], strides = [1, 1]} : vector<2x96xf32> to vector<2x32xf32>
    %67 = vector.extract_strided_slice %49 {offsets = [0, 64], sizes = [2, 32], strides = [1, 1]} : vector<2x96xf32> to vector<2x32xf32>
    %68 = arith.mulf %57, %67 : vector<2x32xf32>
    %69 = arith.addf %66, %68 : vector<2x32xf32>
    %70 = math.tanh %69 : vector<2x32xf32>
    %cst_22 = arith.constant 1.000000e+00 : f32
    %71 = vector.broadcast %cst_22 : f32 to vector<2x32xf32>
    %72 = arith.subf %71, %65 : vector<2x32xf32>
    %73 = arith.mulf %72, %70 : vector<2x32xf32>
    %74 = arith.mulf %65, %41 : vector<2x32xf32>
    %75 = arith.addf %73, %74 : vector<2x32xf32>
    %c0_23 = arith.constant 0 : index
    %c1 = arith.constant 1 : index
    %c0_24 = arith.constant 0 : index
    %76 = vector.load %arg7[%c0_23, %c1, %c0_24] : memref<2x8x32xf32, #tpu.memory_space<vmem>>, vector<2x1x32xf32>
    %77 = vector.shape_cast %76 : vector<2x1x32xf32> to vector<2x32xf32>
    %78 = vector.shape_cast %75 : vector<2x32xf32> to vector<2x1x32xf32>
    tpu.vector_store %arg7[%c0_23, %c1, %c0_24], %78 {strides = array<i32>} : memref<2x8x32xf32, #tpu.memory_space<vmem>>, vector<2x1x32xf32>,
    %79 = vector.extract_strided_slice %7 {offsets = [0, 2, 0], sizes = [2, 1, 96], strides = [1, 1, 1]} : vector<2x8x96xf32> to vector<2x1x96xf32>
    %80 = vector.shape_cast %79 : vector<2x1x96xf32> to vector<2x96xf32>
    %cst_25 = arith.constant dense<0.000000e+00> : vector<2x96xf32>
    %81 = tpu.matmul %75, %9, %cst_25 {dimension_numbers = #tpu.dot_dimension_numbers<[1], [0], [0], [1], [0, 0, 1, 1], [], []>} : vector<2x32xf32>, vector<32x96xf32>, vector<2x96xf32> -> vector<2x96xf32>
    %82 = vector.broadcast %8 : vector<1x96xf32> to vector<2x96xf32>
    %83 = arith.addf %81, %82 : vector<2x96xf32>
    %84 = vector.extract_strided_slice %80 {offsets = [0, 0], sizes = [2, 32], strides = [1, 1]} : vector<2x96xf32> to vector<2x32xf32>
    %85 = vector.extract_strided_slice %83 {offsets = [0, 0], sizes = [2, 32], strides = [1, 1]} : vector<2x96xf32> to vector<2x32xf32>
    %86 = arith.addf %84, %85 : vector<2x32xf32>
    %87 = arith.negf %86 : vector<2x32xf32>
    %88 = math.exp %87 : vector<2x32xf32>
    %cst_26 = arith.constant 1.000000e+00 : f32
    %89 = vector.broadcast %cst_26 : f32 to vector<2x32xf32>
    %90 = arith.addf %89, %88 : vector<2x32xf32>
    %91 = arith.divf %89, %90 : vector<2x32xf32>
    %92 = vector.extract_strided_slice %80 {offsets = [0, 32], sizes = [2, 32], strides = [1, 1]} : vector<2x96xf32> to vector<2x32xf32>
    %93 = vector.extract_strided_slice %83 {offsets = [0, 32], sizes = [2, 32], strides = [1, 1]} : vector<2x96xf32> to vector<2x32xf32>
    %94 = arith.addf %92, %93 : vector<2x32xf32>
    %95 = arith.negf %94 : vector<2x32xf32>
    %96 = math.exp %95 : vector<2x32xf32>
    %cst_27 = arith.constant 1.000000e+00 : f32
    %97 = vector.broadcast %cst_27 : f32 to vector<2x32xf32>
    %98 = arith.addf %97, %96 : vector<2x32xf32>
    %99 = arith.divf %97, %98 : vector<2x32xf32>
    %100 = vector.extract_strided_slice %80 {offsets = [0, 64], sizes = [2, 32], strides = [1, 1]} : vector<2x96xf32> to vector<2x32xf32>
    %101 = vector.extract_strided_slice %83 {offsets = [0, 64], sizes = [2, 32], strides = [1, 1]} : vector<2x96xf32> to vector<2x32xf32>
    %102 = arith.mulf %91, %101 : vector<2x32xf32>
    %103 = arith.addf %100, %102 : vector<2x32xf32>
    %104 = math.tanh %103 : vector<2x32xf32>
    %cst_28 = arith.constant 1.000000e+00 : f32
    %105 = vector.broadcast %cst_28 : f32 to vector<2x32xf32>
    %106 = arith.subf %105, %99 : vector<2x32xf32>
    %107 = arith.mulf %106, %104 : vector<2x32xf32>
    %108 = arith.mulf %99, %75 : vector<2x32xf32>
    %109 = arith.addf %107, %108 : vector<2x32xf32>
    %c0_29 = arith.constant 0 : index
    %c2 = arith.constant 2 : index
    %c0_30 = arith.constant 0 : index
    %110 = vector.load %arg7[%c0_29, %c2, %c0_30] : memref<2x8x32xf32, #tpu.memory_space<vmem>>, vector<2x1x32xf32>
    %111 = vector.shape_cast %110 : vector<2x1x32xf32> to vector<2x32xf32>
    %112 = vector.shape_cast %109 : vector<2x32xf32> to vector<2x1x32xf32>
    tpu.vector_store %arg7[%c0_29, %c2, %c0_30], %112 {strides = array<i32>} : memref<2x8x32xf32, #tpu.memory_space<vmem>>, vector<2x1x32xf32>,
    %113 = vector.extract_strided_slice %7 {offsets = [0, 3, 0], sizes = [2, 1, 96], strides = [1, 1, 1]} : vector<2x8x96xf32> to vector<2x1x96xf32>
    %114 = vector.shape_cast %113 : vector<2x1x96xf32> to vector<2x96xf32>
    %cst_31 = arith.constant dense<0.000000e+00> : vector<2x96xf32>
    %115 = tpu.matmul %109, %9, %cst_31 {dimension_numbers = #tpu.dot_dimension_numbers<[1], [0], [0], [1], [0, 0, 1, 1], [], []>} : vector<2x32xf32>, vector<32x96xf32>, vector<2x96xf32> -> vector<2x96xf32>
    %116 = vector.broadcast %8 : vector<1x96xf32> to vector<2x96xf32>
    %117 = arith.addf %115, %116 : vector<2x96xf32>
    %118 = vector.extract_strided_slice %114 {offsets = [0, 0], sizes = [2, 32], strides = [1, 1]} : vector<2x96xf32> to vector<2x32xf32>
    %119 = vector.extract_strided_slice %117 {offsets = [0, 0], sizes = [2, 32], strides = [1, 1]} : vector<2x96xf32> to vector<2x32xf32>
    %120 = arith.addf %118, %119 : vector<2x32xf32>
    %121 = arith.negf %120 : vector<2x32xf32>
    %122 = math.exp %121 : vector<2x32xf32>
    %cst_32 = arith.constant 1.000000e+00 : f32
    %123 = vector.broadcast %cst_32 : f32 to vector<2x32xf32>
    %124 = arith.addf %123, %122 : vector<2x32xf32>
    %125 = arith.divf %123, %124 : vector<2x32xf32>
    %126 = vector.extract_strided_slice %114 {offsets = [0, 32], sizes = [2, 32], strides = [1, 1]} : vector<2x96xf32> to vector<2x32xf32>
    %127 = vector.extract_strided_slice %117 {offsets = [0, 32], sizes = [2, 32], strides = [1, 1]} : vector<2x96xf32> to vector<2x32xf32>
    %128 = arith.addf %126, %127 : vector<2x32xf32>
    %129 = arith.negf %128 : vector<2x32xf32>
    %130 = math.exp %129 : vector<2x32xf32>
    %cst_33 = arith.constant 1.000000e+00 : f32
    %131 = vector.broadcast %cst_33 : f32 to vector<2x32xf32>
    %132 = arith.addf %131, %130 : vector<2x32xf32>
    %133 = arith.divf %131, %132 : vector<2x32xf32>
    %134 = vector.extract_strided_slice %114 {offsets = [0, 64], sizes = [2, 32], strides = [1, 1]} : vector<2x96xf32> to vector<2x32xf32>
    %135 = vector.extract_strided_slice %117 {offsets = [0, 64], sizes = [2, 32], strides = [1, 1]} : vector<2x96xf32> to vector<2x32xf32>
    %136 = arith.mulf %125, %135 : vector<2x32xf32>
    %137 = arith.addf %134, %136 : vector<2x32xf32>
    %138 = math.tanh %137 : vector<2x32xf32>
    %cst_34 = arith.constant 1.000000e+00 : f32
    %139 = vector.broadcast %cst_34 : f32 to vector<2x32xf32>
    %140 = arith.subf %139, %133 : vector<2x32xf32>
    %141 = arith.mulf %140, %138 : vector<2x32xf32>
    %142 = arith.mulf %133, %109 : vector<2x32xf32>
    %143 = arith.addf %141, %142 : vector<2x32xf32>
    %c0_35 = arith.constant 0 : index
    %c3 = arith.constant 3 : index
    %c0_36 = arith.constant 0 : index
    %144 = vector.load %arg7[%c0_35, %c3, %c0_36] : memref<2x8x32xf32, #tpu.memory_space<vmem>>, vector<2x1x32xf32>
    %145 = vector.shape_cast %144 : vector<2x1x32xf32> to vector<2x32xf32>
    %146 = vector.shape_cast %143 : vector<2x32xf32> to vector<2x1x32xf32>
    tpu.vector_store %arg7[%c0_35, %c3, %c0_36], %146 {strides = array<i32>} : memref<2x8x32xf32, #tpu.memory_space<vmem>>, vector<2x1x32xf32>,
    %147 = vector.extract_strided_slice %7 {offsets = [0, 4, 0], sizes = [2, 1, 96], strides = [1, 1, 1]} : vector<2x8x96xf32> to vector<2x1x96xf32>
    %148 = vector.shape_cast %147 : vector<2x1x96xf32> to vector<2x96xf32>
    %cst_37 = arith.constant dense<0.000000e+00> : vector<2x96xf32>
    %149 = tpu.matmul %143, %9, %cst_37 {dimension_numbers = #tpu.dot_dimension_numbers<[1], [0], [0], [1], [0, 0, 1, 1], [], []>} : vector<2x32xf32>, vector<32x96xf32>, vector<2x96xf32> -> vector<2x96xf32>
    %150 = vector.broadcast %8 : vector<1x96xf32> to vector<2x96xf32>
    %151 = arith.addf %149, %150 : vector<2x96xf32>
    %152 = vector.extract_strided_slice %148 {offsets = [0, 0], sizes = [2, 32], strides = [1, 1]} : vector<2x96xf32> to vector<2x32xf32>
    %153 = vector.extract_strided_slice %151 {offsets = [0, 0], sizes = [2, 32], strides = [1, 1]} : vector<2x96xf32> to vector<2x32xf32>
    %154 = arith.addf %152, %153 : vector<2x32xf32>
    %155 = arith.negf %154 : vector<2x32xf32>
    %156 = math.exp %155 : vector<2x32xf32>
    %cst_38 = arith.constant 1.000000e+00 : f32
    %157 = vector.broadcast %cst_38 : f32 to vector<2x32xf32>
    %158 = arith.addf %157, %156 : vector<2x32xf32>
    %159 = arith.divf %157, %158 : vector<2x32xf32>
    %160 = vector.extract_strided_slice %148 {offsets = [0, 32], sizes = [2, 32], strides = [1, 1]} : vector<2x96xf32> to vector<2x32xf32>
    %161 = vector.extract_strided_slice %151 {offsets = [0, 32], sizes = [2, 32], strides = [1, 1]} : vector<2x96xf32> to vector<2x32xf32>
    %162 = arith.addf %160, %161 : vector<2x32xf32>
    %163 = arith.negf %162 : vector<2x32xf32>
    %164 = math.exp %163 : vector<2x32xf32>
    %cst_39 = arith.constant 1.000000e+00 : f32
    %165 = vector.broadcast %cst_39 : f32 to vector<2x32xf32>
    %166 = arith.addf %165, %164 : vector<2x32xf32>
    %167 = arith.divf %165, %166 : vector<2x32xf32>
    %168 = vector.extract_strided_slice %148 {offsets = [0, 64], sizes = [2, 32], strides = [1, 1]} : vector<2x96xf32> to vector<2x32xf32>
    %169 = vector.extract_strided_slice %151 {offsets = [0, 64], sizes = [2, 32], strides = [1, 1]} : vector<2x96xf32> to vector<2x32xf32>
    %170 = arith.mulf %159, %169 : vector<2x32xf32>
    %171 = arith.addf %168, %170 : vector<2x32xf32>
    %172 = math.tanh %171 : vector<2x32xf32>
    %cst_40 = arith.constant 1.000000e+00 : f32
    %173 = vector.broadcast %cst_40 : f32 to vector<2x32xf32>
    %174 = arith.subf %173, %167 : vector<2x32xf32>
    %175 = arith.mulf %174, %172 : vector<2x32xf32>
    %176 = arith.mulf %167, %143 : vector<2x32xf32>
    %177 = arith.addf %175, %176 : vector<2x32xf32>
    %c0_41 = arith.constant 0 : index
    %c4 = arith.constant 4 : index
    %c0_42 = arith.constant 0 : index
    %178 = vector.load %arg7[%c0_41, %c4, %c0_42] : memref<2x8x32xf32, #tpu.memory_space<vmem>>, vector<2x1x32xf32>
    %179 = vector.shape_cast %178 : vector<2x1x32xf32> to vector<2x32xf32>
    %180 = vector.shape_cast %177 : vector<2x32xf32> to vector<2x1x32xf32>
    tpu.vector_store %arg7[%c0_41, %c4, %c0_42], %180 {strides = array<i32>} : memref<2x8x32xf32, #tpu.memory_space<vmem>>, vector<2x1x32xf32>,
    %181 = vector.extract_strided_slice %7 {offsets = [0, 5, 0], sizes = [2, 1, 96], strides = [1, 1, 1]} : vector<2x8x96xf32> to vector<2x1x96xf32>
    %182 = vector.shape_cast %181 : vector<2x1x96xf32> to vector<2x96xf32>
    %cst_43 = arith.constant dense<0.000000e+00> : vector<2x96xf32>
    %183 = tpu.matmul %177, %9, %cst_43 {dimension_numbers = #tpu.dot_dimension_numbers<[1], [0], [0], [1], [0, 0, 1, 1], [], []>} : vector<2x32xf32>, vector<32x96xf32>, vector<2x96xf32> -> vector<2x96xf32>
    %184 = vector.broadcast %8 : vector<1x96xf32> to vector<2x96xf32>
    %185 = arith.addf %183, %184 : vector<2x96xf32>
    %186 = vector.extract_strided_slice %182 {offsets = [0, 0], sizes = [2, 32], strides = [1, 1]} : vector<2x96xf32> to vector<2x32xf32>
    %187 = vector.extract_strided_slice %185 {offsets = [0, 0], sizes = [2, 32], strides = [1, 1]} : vector<2x96xf32> to vector<2x32xf32>
    %188 = arith.addf %186, %187 : vector<2x32xf32>
    %189 = arith.negf %188 : vector<2x32xf32>
    %190 = math.exp %189 : vector<2x32xf32>
    %cst_44 = arith.constant 1.000000e+00 : f32
    %191 = vector.broadcast %cst_44 : f32 to vector<2x32xf32>
    %192 = arith.addf %191, %190 : vector<2x32xf32>
    %193 = arith.divf %191, %192 : vector<2x32xf32>
    %194 = vector.extract_strided_slice %182 {offsets = [0, 32], sizes = [2, 32], strides = [1, 1]} : vector<2x96xf32> to vector<2x32xf32>
    %195 = vector.extract_strided_slice %185 {offsets = [0, 32], sizes = [2, 32], strides = [1, 1]} : vector<2x96xf32> to vector<2x32xf32>
    %196 = arith.addf %194, %195 : vector<2x32xf32>
    %197 = arith.negf %196 : vector<2x32xf32>
    %198 = math.exp %197 : vector<2x32xf32>
    %cst_45 = arith.constant 1.000000e+00 : f32
    %199 = vector.broadcast %cst_45 : f32 to vector<2x32xf32>
    %200 = arith.addf %199, %198 : vector<2x32xf32>
    %201 = arith.divf %199, %200 : vector<2x32xf32>
    %202 = vector.extract_strided_slice %182 {offsets = [0, 64], sizes = [2, 32], strides = [1, 1]} : vector<2x96xf32> to vector<2x32xf32>
    %203 = vector.extract_strided_slice %185 {offsets = [0, 64], sizes = [2, 32], strides = [1, 1]} : vector<2x96xf32> to vector<2x32xf32>
    %204 = arith.mulf %193, %203 : vector<2x32xf32>
    %205 = arith.addf %202, %204 : vector<2x32xf32>
    %206 = math.tanh %205 : vector<2x32xf32>
    %cst_46 = arith.constant 1.000000e+00 : f32
    %207 = vector.broadcast %cst_46 : f32 to vector<2x32xf32>
    %208 = arith.subf %207, %201 : vector<2x32xf32>
    %209 = arith.mulf %208, %206 : vector<2x32xf32>
    %210 = arith.mulf %201, %177 : vector<2x32xf32>
    %211 = arith.addf %209, %210 : vector<2x32xf32>
    %c0_47 = arith.constant 0 : index
    %c5 = arith.constant 5 : index
    %c0_48 = arith.constant 0 : index
    %212 = vector.load %arg7[%c0_47, %c5, %c0_48] : memref<2x8x32xf32, #tpu.memory_space<vmem>>, vector<2x1x32xf32>
    %213 = vector.shape_cast %212 : vector<2x1x32xf32> to vector<2x32xf32>
    %214 = vector.shape_cast %211 : vector<2x32xf32> to vector<2x1x32xf32>
    tpu.vector_store %arg7[%c0_47, %c5, %c0_48], %214 {strides = array<i32>} : memref<2x8x32xf32, #tpu.memory_space<vmem>>, vector<2x1x32xf32>,
    %215 = vector.extract_strided_slice %7 {offsets = [0, 6, 0], sizes = [2, 1, 96], strides = [1, 1, 1]} : vector<2x8x96xf32> to vector<2x1x96xf32>
    %216 = vector.shape_cast %215 : vector<2x1x96xf32> to vector<2x96xf32>
    %cst_49 = arith.constant dense<0.000000e+00> : vector<2x96xf32>
    %217 = tpu.matmul %211, %9, %cst_49 {dimension_numbers = #tpu.dot_dimension_numbers<[1], [0], [0], [1], [0, 0, 1, 1], [], []>} : vector<2x32xf32>, vector<32x96xf32>, vector<2x96xf32> -> vector<2x96xf32>
    %218 = vector.broadcast %8 : vector<1x96xf32> to vector<2x96xf32>
    %219 = arith.addf %217, %218 : vector<2x96xf32>
    %220 = vector.extract_strided_slice %216 {offsets = [0, 0], sizes = [2, 32], strides = [1, 1]} : vector<2x96xf32> to vector<2x32xf32>
    %221 = vector.extract_strided_slice %219 {offsets = [0, 0], sizes = [2, 32], strides = [1, 1]} : vector<2x96xf32> to vector<2x32xf32>
    %222 = arith.addf %220, %221 : vector<2x32xf32>
    %223 = arith.negf %222 : vector<2x32xf32>
    %224 = math.exp %223 : vector<2x32xf32>
    %cst_50 = arith.constant 1.000000e+00 : f32
    %225 = vector.broadcast %cst_50 : f32 to vector<2x32xf32>
    %226 = arith.addf %225, %224 : vector<2x32xf32>
    %227 = arith.divf %225, %226 : vector<2x32xf32>
    %228 = vector.extract_strided_slice %216 {offsets = [0, 32], sizes = [2, 32], strides = [1, 1]} : vector<2x96xf32> to vector<2x32xf32>
    %229 = vector.extract_strided_slice %219 {offsets = [0, 32], sizes = [2, 32], strides = [1, 1]} : vector<2x96xf32> to vector<2x32xf32>
    %230 = arith.addf %228, %229 : vector<2x32xf32>
    %231 = arith.negf %230 : vector<2x32xf32>
    %232 = math.exp %231 : vector<2x32xf32>
    %cst_51 = arith.constant 1.000000e+00 : f32
    %233 = vector.broadcast %cst_51 : f32 to vector<2x32xf32>
    %234 = arith.addf %233, %232 : vector<2x32xf32>
    %235 = arith.divf %233, %234 : vector<2x32xf32>
    %236 = vector.extract_strided_slice %216 {offsets = [0, 64], sizes = [2, 32], strides = [1, 1]} : vector<2x96xf32> to vector<2x32xf32>
    %237 = vector.extract_strided_slice %219 {offsets = [0, 64], sizes = [2, 32], strides = [1, 1]} : vector<2x96xf32> to vector<2x32xf32>
    %238 = arith.mulf %227, %237 : vector<2x32xf32>
    %239 = arith.addf %236, %238 : vector<2x32xf32>
    %240 = math.tanh %239 : vector<2x32xf32>
    %cst_52 = arith.constant 1.000000e+00 : f32
    %241 = vector.broadcast %cst_52 : f32 to vector<2x32xf32>
    %242 = arith.subf %241, %235 : vector<2x32xf32>
    %243 = arith.mulf %242, %240 : vector<2x32xf32>
    %244 = arith.mulf %235, %211 : vector<2x32xf32>
    %245 = arith.addf %243, %244 : vector<2x32xf32>
    %c0_53 = arith.constant 0 : index
    %c6 = arith.constant 6 : index
    %c0_54 = arith.constant 0 : index
    %246 = vector.load %arg7[%c0_53, %c6, %c0_54] : memref<2x8x32xf32, #tpu.memory_space<vmem>>, vector<2x1x32xf32>
    %247 = vector.shape_cast %246 : vector<2x1x32xf32> to vector<2x32xf32>
    %248 = vector.shape_cast %245 : vector<2x32xf32> to vector<2x1x32xf32>
    tpu.vector_store %arg7[%c0_53, %c6, %c0_54], %248 {strides = array<i32>} : memref<2x8x32xf32, #tpu.memory_space<vmem>>, vector<2x1x32xf32>,
    %249 = vector.extract_strided_slice %7 {offsets = [0, 7, 0], sizes = [2, 1, 96], strides = [1, 1, 1]} : vector<2x8x96xf32> to vector<2x1x96xf32>
    %250 = vector.shape_cast %249 : vector<2x1x96xf32> to vector<2x96xf32>
    %cst_55 = arith.constant dense<0.000000e+00> : vector<2x96xf32>
    %251 = tpu.matmul %245, %9, %cst_55 {dimension_numbers = #tpu.dot_dimension_numbers<[1], [0], [0], [1], [0, 0, 1, 1], [], []>} : vector<2x32xf32>, vector<32x96xf32>, vector<2x96xf32> -> vector<2x96xf32>
    %252 = vector.broadcast %8 : vector<1x96xf32> to vector<2x96xf32>
    %253 = arith.addf %251, %252 : vector<2x96xf32>
    %254 = vector.extract_strided_slice %250 {offsets = [0, 0], sizes = [2, 32], strides = [1, 1]} : vector<2x96xf32> to vector<2x32xf32>
    %255 = vector.extract_strided_slice %253 {offsets = [0, 0], sizes = [2, 32], strides = [1, 1]} : vector<2x96xf32> to vector<2x32xf32>
    %256 = arith.addf %254, %255 : vector<2x32xf32>
    %257 = arith.negf %256 : vector<2x32xf32>
    %258 = math.exp %257 : vector<2x32xf32>
    %cst_56 = arith.constant 1.000000e+00 : f32
    %259 = vector.broadcast %cst_56 : f32 to vector<2x32xf32>
    %260 = arith.addf %259, %258 : vector<2x32xf32>
    %261 = arith.divf %259, %260 : vector<2x32xf32>
    %262 = vector.extract_strided_slice %250 {offsets = [0, 32], sizes = [2, 32], strides = [1, 1]} : vector<2x96xf32> to vector<2x32xf32>
    %263 = vector.extract_strided_slice %253 {offsets = [0, 32], sizes = [2, 32], strides = [1, 1]} : vector<2x96xf32> to vector<2x32xf32>
    %264 = arith.addf %262, %263 : vector<2x32xf32>
    %265 = arith.negf %264 : vector<2x32xf32>
    %266 = math.exp %265 : vector<2x32xf32>
    %cst_57 = arith.constant 1.000000e+00 : f32
    %267 = vector.broadcast %cst_57 : f32 to vector<2x32xf32>
    %268 = arith.addf %267, %266 : vector<2x32xf32>
    %269 = arith.divf %267, %268 : vector<2x32xf32>
    %270 = vector.extract_strided_slice %250 {offsets = [0, 64], sizes = [2, 32], strides = [1, 1]} : vector<2x96xf32> to vector<2x32xf32>
    %271 = vector.extract_strided_slice %253 {offsets = [0, 64], sizes = [2, 32], strides = [1, 1]} : vector<2x96xf32> to vector<2x32xf32>
    %272 = arith.mulf %261, %271 : vector<2x32xf32>
    %273 = arith.addf %270, %272 : vector<2x32xf32>
    %274 = math.tanh %273 : vector<2x32xf32>
    %cst_58 = arith.constant 1.000000e+00 : f32
    %275 = vector.broadcast %cst_58 : f32 to vector<2x32xf32>
    %276 = arith.subf %275, %269 : vector<2x32xf32>
    %277 = arith.mulf %276, %274 : vector<2x32xf32>
    %278 = arith.mulf %269, %245 : vector<2x32xf32>
    %279 = arith.addf %277, %278 : vector<2x32xf32>
    %c0_59 = arith.constant 0 : index
    %c7 = arith.constant 7 : index
    %c0_60 = arith.constant 0 : index
    %280 = vector.load %arg7[%c0_59, %c7, %c0_60] : memref<2x8x32xf32, #tpu.memory_space<vmem>>, vector<2x1x32xf32>
    %281 = vector.shape_cast %280 : vector<2x1x32xf32> to vector<2x32xf32>
    %282 = vector.shape_cast %279 : vector<2x32xf32> to vector<2x1x32xf32>
    tpu.vector_store %arg7[%c0_59, %c7, %c0_60], %282 {strides = array<i32>} : memref<2x8x32xf32, #tpu.memory_space<vmem>>, vector<2x1x32xf32>,
    %c0_61 = arith.constant 0 : index
    %c0_62 = arith.constant 0 : index
    %283 = vector.load %arg8[%c0_61, %c0_62] : memref<2x32xf32, #tpu.memory_space<vmem>>, vector<2x32xf32>
    tpu.vector_store %arg8[%c0_61, %c0_62], %279 {strides = array<i32>} : memref<2x32xf32, #tpu.memory_space<vmem>>, vector<2x32xf32>,
    return
  }
  func.func @transform_0(%arg0: i32) -> (i32, i32, i32) {
    %c0_i32 = arith.constant 0 : i32
    %c0_i32_0 = arith.constant 0 : i32
    %c0_i32_1 = arith.constant 0 : i32
    %c0_i32_2 = arith.constant 0 : i32
    return %c0_i32, %c0_i32_0, %c0_i32_1 : i32, i32, i32
  }
  func.func @transform_1(%arg0: i32) -> (i32, i32) {
    %c0_i32 = arith.constant 0 : i32
    %c0_i32_0 = arith.constant 0 : i32
    %c0_i32_1 = arith.constant 0 : i32
    return %c0_i32, %c0_i32_0 : i32, i32
  }
  func.func @transform_2(%arg0: i32) -> (i32, i32) {
    %c0_i32 = arith.constant 0 : i32
    %c0_i32_0 = arith.constant 0 : i32
    %c0_i32_1 = arith.constant 0 : i32
    return %c0_i32, %c0_i32_0 : i32, i32
  }
  func.func @transform_3(%arg0: i32) -> (i32, i32) {
    %c0_i32 = arith.constant 0 : i32
    %c0_i32_0 = arith.constant 0 : i32
    %c0_i32_1 = arith.constant 0 : i32
    return %c0_i32, %c0_i32_0 : i32, i32
  }
  func.func @transform_4(%arg0: i32) -> (i32, i32) {
    %c0_i32 = arith.constant 0 : i32
    %c0_i32_0 = arith.constant 0 : i32
    %c0_i32_1 = arith.constant 0 : i32
    return %c0_i32, %c0_i32_0 : i32, i32
  }
  func.func @transform_5(%arg0: i32) -> (i32, i32) {
    %c0_i32 = arith.constant 0 : i32
    %c0_i32_0 = arith.constant 0 : i32
    %c0_i32_1 = arith.constant 0 : i32
    return %c0_i32, %c0_i32_0 : i32, i32
  }
  func.func @transform_6(%arg0: i32) -> (i32, i32, i32) {
    %c0_i32 = arith.constant 0 : i32
    %c0_i32_0 = arith.constant 0 : i32
    %c0_i32_1 = arith.constant 0 : i32
    %c0_i32_2 = arith.constant 0 : i32
    return %c0_i32, %c0_i32_0, %c0_i32_1 : i32, i32, i32
  }
  func.func @transform_7(%arg0: i32) -> (i32, i32) {
    %c0_i32 = arith.constant 0 : i32
    %c0_i32_0 = arith.constant 0 : i32
    %c0_i32_1 = arith.constant 0 : i32
    return %c0_i32, %c0_i32_0 : i32, i32
  }
}

</mosaic_0001>

<bundles_post_ra>
// kernel: gru_decoder_forward.1
= control target key start
LH: loop header
LB: loop body
LE: loop exit
PB: predicated region body
PF: predicated region fallthrough
CT: control target
= control target key end

     0   :  { %13 = vsyncpa [#allocation3], 0  ;;  %s1718_s0 = inlined_call_operand.hbm [shape: f32[2,8,16], index: 0, kind: input, shape index: {}]   ;;  %s1719_s1 = inlined_call_operand.hbm [shape: f32[16,96], index: 1, kind: input, shape index: {}]   ;;  %s1720_s2 = inlined_call_operand.hbm [shape: f32[32,96], index: 2, kind: input, shape index: {}]   ;;  %s1721_s3 = inlined_call_operand.vmem [shape: f32[1,96], index: 3, kind: input, shape index: {}]   ;;  %s1722_s4 = inlined_call_operand.vmem [shape: f32[1,96], index: 4, kind: input, shape index: {}]   ;;  %s1723_s5 = inlined_call_operand.vmem [shape: f32[2,32], index: 5, kind: input, shape index: {}]   ;;  %s1724_s6 = inlined_call_operand.hbm [shape: f32[2,8,32], index: 6, kind: output, shape index: {0}]   ;;  %s1725_s7 = inlined_call_operand.hbm [shape: f32[2,32], index: 7, kind: output, shape index: {1}]  }
   0x1   :  { %14 = vsyncpa [#allocation6], 0 }
   0x2   :  { %15 = vsyncpa [#allocation4], 0 }
   0x3   :  { %16 = vsyncpa [#allocation10], 0  ;;  %s34_s26 = sshll.u32 %s1719_s1, 4  ;;  %s1406_s27 = smov [#allocation5]   ;;  %s35_s26 = int_to_ptr.hbm [resolvable:$true] %s34_s26 }
   0x4   :  { %s36_s28 = sshll.u32 %s1406_s27, 4  ;;  %s21_s8 = sshll.u32 %s1718_s0, 4  ;;  %s37_s28 = int_to_ptr.vmem [resolvable:$true] %s36_s28  ;;  %s22_s8 = int_to_ptr.hbm [resolvable:$true] %s21_s8 }
   0x5   :  { %s1407_s9 = smov 128   ;;  %s1408_s10 = smov 8  }
   0x6   :  { %42 = dma.hbm_to_vmem [thread:$0]  %s35_s26, 256, %s37_s28, [#allocation6], %s1407_s9, %s1407_s9, %s1408_s10  }
   0x7   :  { %s1409_s11 = smov [#allocation2]   ;;  %s47_s1 = sshll.u32 %s1720_s2, 4  ;;  %s48_s1 = int_to_ptr.hbm [resolvable:$true] %s47_s1 }
   0x8   :  { %s23_s12 = sshll.u32 %s1409_s11, 4  ;;  %s1410_s0 = smov [#allocation7]   ;;  %s24_s12 = int_to_ptr.vmem [resolvable:$true] %s23_s12 }
   0x9   :  { %29 = dma.hbm_to_vmem [thread:$0]  %s22_s8, 256, %s24_s12, [#allocation3], %s1407_s9, %s1407_s9, %s1408_s10  }
   0xa   :  { %s49_s15 = sshll.u32 %s1410_s0, 4  ;;  %s50_s15 = int_to_ptr.vmem [resolvable:$true] %s49_s15 }
   0xb   :  { %55 = dma.hbm_to_vmem [thread:$0]  %s48_s1, 512, %s50_s15, [#allocation6], %s1407_s9, %s1407_s9, %s1408_s10  }
   0xc   :  { %1398 = dma.done.wait [#allocation3], 256  }
   0xd   :  { %1399 = vsyncadd [#allocation3], 4294967040 }
   0xe   :  { %1400 = dma.done.wait [#allocation6], 768  }
   0xf   :  { %1401 = vsyncadd [#allocation6], 4294966528  ;;  %v77_v0 = vld [vmem:[#allocation5 + $0x8] sm:$0xff]  ;;  %v76_v2 = vld [vmem:[#allocation5] sm:$0xff]  ;;  %vm82_vm0 = vcmask 130048   ;;  %vm121_vm1 = vcmask 261120  }
  0x10   :  { %v116_v1 = vld [vmem:[#allocation7 + $0x18] sm:$0xff]  ;;  %103 = vmatpush.msra.mxu0 %v77_v0  ;;  %v115_v3 = vld [vmem:[#allocation7 + $0x10] sm:$0xff]  ;;  %v74_v4 = vld [vmem:[#allocation2] sm:$0xff]  ;;  %s1411_s18 = smov 64   ;;  %s1413_s21 = smov 96   ;;  %vm244_vm10 = vcmask 1041409  }
  0x11   :  { %137 = vmatpush.msra.mxu1 %v116_v1  ;;  %v114_v5 = vld [vmem:[#allocation7 + $0x8] sm:$0xff]  ;;  %262 = vmatpush.msra.mxu2 %v116_v1  ;;  %v113_v6 = vld [vmem:[#allocation7] sm:$0xff]  ;;  %s1113_s27 = sshll.u32 %s1724_s6, 4  ;;  %s1415_s28 = smov [#allocation9]   ;;  %s1114_s27 = int_to_ptr.hbm [resolvable:$true] %s1113_s27 }
  0x12   :  { %382 = vmatpush.msra.mxu3 %v116_v1  ;;  %104 = vmatpush.msra.mxu0 %v76_v2  ;;  %v1478_v7 = vld [vmem:[%s1723_s5] sm:$0x3]  ;;  %v75_v8 = vld [vmem:[#allocation2 + $0x8] sm:$0xff]  ;;  %s1125_s29 = sshll.u32 %s1415_s28, 4  ;;  %s1127_s11 = sshll.u32 %s1725_s7, 4  ;;  %s1126_s29 = int_to_ptr.vmem [resolvable:$true] %s1125_s29  ;;  %s1128_s11 = int_to_ptr.hbm [resolvable:$true] %s1127_s11 }
  0x13   :  { %138 = vmatpush.msra.mxu1 %v115_v3  ;;  %1143 = vmatmul.msk.f32.vlgmr.msra.gmra.mxu0 %vm82_vm0, %v74_v4  ;;  %v1486_v9 = vld [vmem:[%s1722_s4] ss:$0 sm:$0xff]  ;;  %v221_v55 = vrot.slane %v1478_v7, 1 }
  0x14   :  { %263 = vmatpush.msra.mxu2 %v115_v3  ;;  %383 = vmatpush.msra.mxu3 %v115_v3  ;;  %v1179_v15 = vld [vmem:[%s1721_s3] ss:$0 sm:$0xff]  ;;  %s1412_s3 = smov 32  }
  0x15   :  { %139 = vmatpush.msra.mxu1 %v114_v5  ;;  %874 = vmatpush.msrb.mxu0 %v116_v1 }
  0x16   :  { %264 = vmatpush.msra.mxu2 %v114_v5  ;;  %384 = vmatpush.msra.mxu3 %v114_v5 }
  0x17   :  { %140 = vmatpush.msra.mxu1 %v113_v6  ;;  %875 = vmatpush.msrb.mxu0 %v115_v3 }
  0x18   :  { %1145 = vmatmul.msk.f32.vlgmr.msra.gmra.mxu1 %vm121_vm1, %v1478_v7  ;;  %265 = vmatpush.msra.mxu2 %v113_v6 }
  0x19   :  { %385 = vmatpush.msra.mxu3 %v113_v6  ;;  %505 = vmatpush.msrb.mxu1 %v116_v1 }
  0x1a   :  { %628 = vmatpush.msrb.mxu2 %v116_v1  ;;  %876 = vmatpush.msrb.mxu0 %v114_v5 }
  0x1b   :  { %751 = vmatpush.msrb.mxu3 %v116_v1  ;;  %506 = vmatpush.msrb.mxu1 %v115_v3 }
  0x1c   :  { %1144 = vmatmul.msk.f32.gmra.mxu0 %vm82_vm0, %v75_v8  ;;  %629 = vmatpush.msrb.mxu2 %v115_v3 }
  0x1d   :  { %507 = vmatpush.msrb.mxu1 %v114_v5  ;;  %752 = vmatpush.msrb.mxu3 %v115_v3 }
  0x1e   :  { %630 = vmatpush.msrb.mxu2 %v114_v5  ;;  %877 = vmatpush.msrb.mxu0 %v113_v6 }
  0x1f   :  { %508 = vmatpush.msrb.mxu1 %v113_v6  ;;  %753 = vmatpush.msrb.mxu3 %v114_v5 }
  0x20   :  { %631 = vmatpush.msrb.mxu2 %v113_v6 }
  0x21   :  { %754 = vmatpush.msrb.mxu3 %v113_v6  ;;  %997 = vmatpush.msra.mxu1 %v116_v1 }
  0x23   :  { %998 = vmatpush.msra.mxu1 %v115_v3 }
  0x25   :  { %999 = vmatpush.msra.mxu1 %v114_v5 }
  0x27   :  { %1000 = vmatpush.msra.mxu1 %v113_v6 }
  0x90   :  { %v106_v13 = vpop.f32.mrf.mxu0 }
  0x91   :  { %v1497_v18 = vadd.f32 %v1179_v15, %v106_v13 }
  0x95   :  { %v142_v10 = vpop.f32.mrf.mxu1 }
  0x96   :  { %v143_v11 = vadd.f32 %v1486_v9, %v142_v10 }
  0x98   :  { %v146_v12 = vrot.slane %v143_v11, 1  ;;  %v149_v20 = vadd.f32 %v143_v11, %v1497_v18 }
  0x99   :  { %v109_v14 = vpop.f32.mrf.mxu0 }
  0x9a   :  { %191 = vrot.lane.b32.xlu0 %v146_v12, %s1411_s18  ;;  %v1494_v16 = vadd.f32 %v1179_v15, %v109_v14  ;;  %v1146_v21 = vmul.f32 -1.442695, %v149_v20 }
  0x9c   :  { %v150_v17 = vadd.f32 %v146_v12, %v1494_v16 }
  0x9e   :  { %v1147_v19 = vmul.f32 -1.442695, %v150_v17 }
  0xa0   :  { %1181 = vpow2.f32 %v1147_v19 }
  0xa1   :  { %1183 = vpow2.f32 %v1146_v21 }
  0xa2   :  { %189 = vrot.lane.b32.xlu0 %v143_v11, %s1411_s18 }
  0xa6   :  { %v1182_v22 = vpop.eup %1181 }
  0xa7   :  { %v158_v23 = vadd.f32 1.0, %v1182_v22  ;;  %v1184_v24 = vpop.eup %1183 }
  0xa8   :  { %v157_v25 = vadd.f32 1.0, %v1184_v24 }
  0xa9   :  { %1185 = vrcp.f32 %v158_v23  ;;  %v185_v34 = vand.u32 2147483648, %v158_v23  ;;  %vm179_vm3 = vweird.f32 %v158_v23  ;;  %v183_v35 = vand.u32 2147483647, %v158_v23 }
  0xaa   :  { %1187 = vrcp.f32 %v157_v25  ;;  %v170_v43 = vand.u32 2147483648, %v157_v25  ;;  %vm164_vm7 = vweird.f32 %v157_v25  ;;  %v168_v44 = vand.u32 2147483647, %v157_v25 }
  0xab   :  { %v186_v38 = vor.u32 1.1754944e-38, %v185_v34  ;;  %vm184_vm5 = vcmp.eq.f32.partialorder %v183_v35, 8.507059e+37 }
  0xac   :  { %v171_v46 = vor.u32 1.1754944e-38, %v170_v43  ;;  %vm169_vm9 = vcmp.eq.f32.partialorder %v168_v44, 8.507059e+37 }
  0xaf   :  { %v1186_v26 = vpop.eup %1185 }
  0xb0   :  { %v175_v27 = vmul.f32 %v1186_v26, %v158_v23  ;;  %v1188_v29 = vpop.eup %1187  ;;  %vm180_vm2 = vweird.f32 %v1186_v26 }
  0xb1   :  { %v160_v31 = vmul.f32 %v1188_v29, %v157_v25  ;;  %vm181_vm4 = vmor %vm179_vm3, %vm180_vm2  ;;  %vm165_vm6 = vweird.f32 %v1188_v29 }
  0xb2   :  { %v176_v28 = vsub.f32 1.0, %v175_v27  ;;  %vm166_vm8 = vmor %vm164_vm7, %vm165_vm6 }
  0xb3   :  { %v161_v33 = vsub.f32 1.0, %v160_v31 }
  0xb4   :  { %v177_v30 = vmul.f32 %v1186_v26, %v176_v28 }
  0xb5   :  { %v162_v37 = vmul.f32 %v1188_v29, %v161_v33 }
  0xb6   :  { %v178_v32 = vadd.f32 %v1186_v26, %v177_v30 }
  0xb7   :  { %v163_v42 = vadd.f32 %v1188_v29, %v162_v37 }
  0xb8   :  { %v182_v36 = vsel %vm181_vm4, %v1186_v26, %v178_v32 }
  0xb9   :  { %v187_v40 = vsel %vm184_vm5, %v186_v38, %v182_v36  ;;  %v167_v45 = vsel %vm166_vm8, %v1188_v29, %v163_v42 }
  0xba   :  { %v172_v48 = vsel %vm169_vm9, %v171_v46, %v167_v45  ;;  %v210_v59 = vsub.f32 1.0, %v187_v40 }
  0xbb   :  { %v209_v0 = vsub.f32 1.0, %v172_v48 }
 0x10c   :  { %v192_v39 = vpop.permute.xlu0 %191 }
 0x10d   :  { %v196_v41 = vmul.f32 %v192_v39, %v187_v40 }
 0x10f   :  { %201 = vrot.lane.b32.xlu1 %v196_v41, %s1411_s18 }
 0x114   :  { %v190_v47 = vpop.permute.xlu0 %189 }
 0x115   :  { %v195_v49 = vmul.f32 %v190_v47, %v172_v48 }
 0x117   :  { %199 = vrot.lane.b32.xlu1 %v195_v49, %s1411_s18 }
 0x11f   :  { %222 = vrot.lane.b32.xlu1 %v1478_v7, %s1412_s3 }
 0x181   :  { %v202_v50 = vpop.permute.xlu1 %201 }
 0x182   :  { %v206_v51 = vadd.f32 %v202_v50, %v1494_v16 }
 0x184   :  { %1189 = vtanh.f32 %v206_v51 }
 0x189   :  { %v200_v52 = vpop.permute.xlu1 %199 }
 0x18a   :  { %v1190_v53 = vpop.eup %1189  ;;  %v205_v54 = vadd.f32 %v200_v52, %v1497_v18 }
 0x18b   :  { %215 = vrot.lane.b32.xlu2 %v1190_v53, %s1413_s21 }
 0x18c   :  { %1191 = vtanh.f32 %v205_v54 }
 0x191   :  { %v223_v62 = vpop.permute.xlu1 %222 }
 0x192   :  { %v1192_v56 = vpop.eup %1191  ;;  %v228_v2 = vmul.f32 %v223_v62, %v172_v48 }
 0x193   :  { %224 = vrot.lane.b32.xlu2 %v221_v55, %s1412_s3  ;;  %213 = vrot.lane.b32.xlu0 %v1192_v56, %s1413_s21 }
 0x1e5   :  { %v216_v57 = vpop.permute.xlu2 %215 }
 0x1e6   :  { %v220_v61 = vmul.f32 %v216_v57, %v210_v59 }
 0x1ed   :  { %v225_v58 = vpop.permute.xlu2 %224 }
 0x1ee   :  { %v229_v60 = vmul.f32 %v225_v58, %v187_v40 }
 0x1f0   :  { %v1508_v63 = vadd.f32 %v229_v60, %v220_v61 }
 0x1f2   :  { %v243_v4 = vrot.slane %v1508_v63, 7 }
 0x205   :  { %v214_v1 = vpop.permute.xlu0 %213 }
 0x206   :  { %v219_v3 = vmul.f32 %v214_v1, %v209_v0 }
 0x208   :  { %v1511_v5 = vadd.f32 %v228_v2, %v219_v3 }
 0x20a   :  { %v245_v6 = vsel %vm244_vm10, %v243_v4, %v1511_v5  ;;  %v346_v55 = vrot.slane %v1511_v5, 7 }
 0x20b   :  { %246 = vrot.lane.b32.xlu2 %v245_v6, %s1413_s21 }
 0x265   :  { %v247_v7 = vpop.permute.xlu2 %246 }
 0x266   :  { %1148 = vmatmul.msk.f32.vlgmr.msra.gmra.mxu2 %vm121_vm1, %v247_v7 }
 0x2e9   :  { %v267_v8 = vpop.f32.mrf.mxu2 }
 0x2ea   :  { %v268_v10 = vadd.f32 %v1486_v9, %v267_v8 }
 0x2ec   :  { %316 = vrot.lane.b32.xlu1 %v268_v10, %s1411_s18  ;;  %v271_v11 = vrot.slane %v268_v10, 7  ;;  %v275_v12 = vadd.f32 %v268_v10, %v1494_v16 }
 0x2ee   :  { %314 = vrot.lane.b32.xlu0 %v271_v11, %s1411_s18  ;;  %v274_v13 = vadd.f32 %v271_v11, %v1497_v18  ;;  %v1150_v14 = vmul.f32 -1.442695, %v275_v12 }
 0x2f0   :  { %v1149_v15 = vmul.f32 -1.442695, %v274_v13  ;;  %1193 = vpow2.f32 %v1150_v14 }
 0x2f2   :  { %1195 = vpow2.f32 %v1149_v15 }
 0x2f6   :  { %v1194_v17 = vpop.eup %1193 }
 0x2f7   :  { %v283_v20 = vadd.f32 1.0, %v1194_v17 }
 0x2f8   :  { %v1196_v19 = vpop.eup %1195 }
 0x2f9   :  { %v282_v21 = vadd.f32 1.0, %v1196_v19  ;;  %1197 = vrcp.f32 %v283_v20  ;;  %v310_v31 = vand.u32 2147483648, %v283_v20  ;;  %vm304_vm12 = vweird.f32 %v283_v20 }
 0x2fa   :  { %v308_v32 = vand.u32 2147483647, %v283_v20 }
 0x2fb   :  { %1199 = vrcp.f32 %v282_v21  ;;  %v295_v34 = vand.u32 2147483648, %v282_v21  ;;  %vm289_vm15 = vweird.f32 %v282_v21  ;;  %v293_v36 = vand.u32 2147483647, %v282_v21 }
 0x2fc   :  { %v311_v37 = vor.u32 1.1754944e-38, %v310_v31  ;;  %vm309_vm2 = vcmp.eq.f32.partialorder %v308_v32, 8.507059e+37 }
 0x2fd   :  { %v296_v41 = vor.u32 1.1754944e-38, %v295_v34  ;;  %vm294_vm3 = vcmp.eq.f32.partialorder %v293_v36, 8.507059e+37 }
 0x2ff   :  { %v1198_v22 = vpop.eup %1197 }
 0x300   :  { %v300_v24 = vmul.f32 %v1198_v22, %v283_v20  ;;  %vm305_vm11 = vweird.f32 %v1198_v22 }
 0x301   :  { %v1200_v23 = vpop.eup %1199  ;;  %vm306_vm14 = vmor %vm304_vm12, %vm305_vm11 }
 0x302   :  { %v285_v25 = vmul.f32 %v1200_v23, %v282_v21  ;;  %v301_v26 = vsub.f32 1.0, %v300_v24  ;;  %vm290_vm13 = vweird.f32 %v1200_v23 }
 0x303   :  { %vm291_vm0 = vmor %vm289_vm15, %vm290_vm13 }
 0x304   :  { %v286_v27 = vsub.f32 1.0, %v285_v25  ;;  %v302_v28 = vmul.f32 %v1198_v22, %v301_v26 }
 0x306   :  { %v287_v29 = vmul.f32 %v1200_v23, %v286_v27  ;;  %v303_v30 = vadd.f32 %v1198_v22, %v302_v28 }
 0x308   :  { %v288_v33 = vadd.f32 %v1200_v23, %v287_v29  ;;  %v307_v35 = vsel %vm306_vm14, %v1198_v22, %v303_v30 }
 0x309   :  { %v312_v40 = vsel %vm309_vm2, %v311_v37, %v307_v35 }
 0x30a   :  { %v292_v38 = vsel %vm291_vm0, %v1200_v23, %v288_v33  ;;  %v335_v53 = vsub.f32 1.0, %v312_v40  ;;  %v350_v60 = vmul.f32 %v312_v40, %v243_v4 }
 0x30b   :  { %v297_v44 = vsel %vm294_vm3, %v296_v41, %v292_v38 }
 0x30c   :  { %v334_v54 = vsub.f32 1.0, %v297_v44  ;;  %v349_v58 = vmul.f32 %v346_v55, %v297_v44 }
 0x35e   :  { %v317_v39 = vpop.permute.xlu1 %316 }
 0x35f   :  { %v321_v42 = vmul.f32 %v317_v39, %v312_v40 }
 0x360   :  { %v315_v43 = vpop.permute.xlu0 %314 }
 0x361   :  { %v320_v45 = vmul.f32 %v315_v43, %v297_v44  ;;  %326 = vrot.lane.b32.xlu0 %v321_v42, %s1411_s18 }
 0x363   :  { %324 = vrot.lane.b32.xlu2 %v320_v45, %s1411_s18 }
 0x3bd   :  { %v325_v46 = vpop.permute.xlu2 %324 }
 0x3be   :  { %v330_v47 = vadd.f32 %v325_v46, %v1497_v18 }
 0x3c0   :  { %1201 = vtanh.f32 %v330_v47 }
 0x3c6   :  { %v1202_v48 = vpop.eup %1201 }
 0x3c7   :  { %338 = vrot.lane.b32.xlu1 %v1202_v48, %s1413_s21 }
 0x3d3   :  { %v327_v49 = vpop.permute.xlu0 %326 }
 0x3d4   :  { %v331_v50 = vadd.f32 %v327_v49, %v1494_v16 }
 0x3d6   :  { %1203 = vtanh.f32 %v331_v50 }
 0x3dc   :  { %v1204_v51 = vpop.eup %1203 }
 0x3dd   :  { %340 = vrot.lane.b32.xlu2 %v1204_v51, %s1413_s21 }
 0x437   :  { %v341_v52 = vpop.permute.xlu2 %340 }
 0x438   :  { %v345_v57 = vmul.f32 %v341_v52, %v335_v53 }
 0x439   :  { %v339_v56 = vpop.permute.xlu1 %338 }
 0x43a   :  { %v344_v59 = vmul.f32 %v339_v56, %v334_v54  ;;  %v1535_v62 = vadd.f32 %v350_v60, %v345_v57 }
 0x43c   :  { %v1533_v61 = vadd.f32 %v349_v58, %v344_v59  ;;  %v468_v52 = vrot.slane %v1535_v62, 7 }
 0x43e   :  { %v364_v0 = vrot.slane %v1533_v61, 1  ;;  %v467_v50 = vrot.slane %v1533_v61, 7 }
 0x440   :  { %v365_v1 = vsel %vm244_vm10, %v1535_v62, %v364_v0 }
 0x441   :  { %366 = vrot.lane.b32.xlu0 %v365_v1, %s1413_s21 }
 0x4b3   :  { %v367_v2 = vpop.permute.xlu0 %366 }
 0x4b4   :  { %1151 = vmatmul.msk.f32.vlgmr.msra.gmra.mxu3 %vm121_vm1, %v367_v2 }
 0x537   :  { %v387_v3 = vpop.f32.mrf.mxu3 }
 0x538   :  { %v388_v6 = vadd.f32 %v1486_v9, %v387_v3 }
 0x53a   :  { %v391_v7 = vrot.slane %v388_v6, 6  ;;  %v392_v8 = vrot.slane %v388_v6, 7 }
 0x53c   :  { %437 = vrot.lane.b32.xlu2 %v392_v8, %s1411_s18  ;;  %435 = vrot.lane.b32.xlu1 %v391_v7, %s1411_s18  ;;  %v396_v4 = vadd.f32 %v392_v8, %v1494_v16  ;;  %v395_v13 = vadd.f32 %v391_v7, %v1497_v18 }
 0x53e   :  { %v1153_v10 = vmul.f32 -1.442695, %v396_v4  ;;  %v1152_v15 = vmul.f32 -1.442695, %v395_v13 }
 0x540   :  { %1205 = vpow2.f32 %v1153_v10 }
 0x546   :  { %v1206_v11 = vpop.eup %1205 }
 0x547   :  { %v404_v12 = vadd.f32 1.0, %v1206_v11 }
 0x549   :  { %1207 = vrcp.f32 %v404_v12  ;;  %v431_v24 = vand.u32 2147483648, %v404_v12  ;;  %vm425_vm5 = vweird.f32 %v404_v12  ;;  %v429_v25 = vand.u32 2147483647, %v404_v12 }
 0x54a   :  { %1209 = vpow2.f32 %v1152_v15 }
 0x54b   :  { %v432_v27 = vor.u32 1.1754944e-38, %v431_v24  ;;  %vm430_vm7 = vcmp.eq.f32.partialorder %v429_v25, 8.507059e+37 }
 0x54f   :  { %v1208_v14 = vpop.eup %1207 }
 0x550   :  { %v421_v17 = vmul.f32 %v1208_v14, %v404_v12  ;;  %v1210_v20 = vpop.eup %1209  ;;  %vm426_vm4 = vweird.f32 %v1208_v14 }
 0x551   :  { %v403_v22 = vadd.f32 1.0, %v1210_v20  ;;  %vm427_vm6 = vmor %vm425_vm5, %vm426_vm4 }
 0x552   :  { %v422_v19 = vsub.f32 1.0, %v421_v17 }
 0x553   :  { %1211 = vrcp.f32 %v403_v22  ;;  %v416_v36 = vand.u32 2147483648, %v403_v22  ;;  %vm410_vm9 = vweird.f32 %v403_v22  ;;  %v414_v37 = vand.u32 2147483647, %v403_v22 }
 0x554   :  { %v423_v21 = vmul.f32 %v1208_v14, %v422_v19 }
 0x555   :  { %v417_v39 = vor.u32 1.1754944e-38, %v416_v36  ;;  %vm415_vm12 = vcmp.eq.f32.partialorder %v414_v37, 8.507059e+37 }
 0x556   :  { %v424_v23 = vadd.f32 %v1208_v14, %v423_v21 }
 0x558   :  { %v428_v26 = vsel %vm427_vm6, %v1208_v14, %v424_v23 }
 0x559   :  { %v433_v29 = vsel %vm430_vm7, %v432_v27, %v428_v26  ;;  %v1212_v31 = vpop.eup %1211 }
 0x55a   :  { %v406_v32 = vmul.f32 %v1212_v31, %v403_v22  ;;  %vm411_vm8 = vweird.f32 %v1212_v31  ;;  %v456_v51 = vsub.f32 1.0, %v433_v29  ;;  %v472_v57 = vmul.f32 %v468_v52, %v433_v29 }
 0x55b   :  { %vm412_vm11 = vmor %vm410_vm9, %vm411_vm8 }
 0x55c   :  { %v407_v33 = vsub.f32 1.0, %v406_v32 }
 0x55e   :  { %v408_v34 = vmul.f32 %v1212_v31, %v407_v33 }
 0x560   :  { %v409_v35 = vadd.f32 %v1212_v31, %v408_v34 }
 0x562   :  { %v413_v38 = vsel %vm412_vm11, %v1212_v31, %v409_v35 }
 0x563   :  { %v418_v41 = vsel %vm415_vm12, %v417_v39, %v413_v38 }
 0x564   :  { %v455_v49 = vsub.f32 1.0, %v418_v41  ;;  %v471_v55 = vmul.f32 %v467_v50, %v418_v41 }
 0x596   :  { %v438_v28 = vpop.permute.xlu2 %437 }
 0x597   :  { %v442_v30 = vmul.f32 %v438_v28, %v433_v29 }
 0x599   :  { %447 = vrot.lane.b32.xlu1 %v442_v30, %s1411_s18 }
 0x5ae   :  { %v436_v40 = vpop.permute.xlu1 %435 }
 0x5af   :  { %v441_v42 = vmul.f32 %v436_v40, %v418_v41 }
 0x5b1   :  { %445 = vrot.lane.b32.xlu0 %v441_v42, %s1411_s18 }
 0x60b   :  { %v448_v43 = vpop.permute.xlu1 %447 }
 0x60c   :  { %v452_v44 = vadd.f32 %v448_v43, %v1494_v16 }
 0x60e   :  { %1213 = vtanh.f32 %v452_v44 }
 0x614   :  { %v1214_v45 = vpop.eup %1213 }
 0x615   :  { %461 = vrot.lane.b32.xlu0 %v1214_v45, %s1413_s21 }
 0x623   :  { %v446_v46 = vpop.permute.xlu0 %445 }
 0x624   :  { %v451_v47 = vadd.f32 %v446_v46, %v1497_v18 }
 0x626   :  { %1215 = vtanh.f32 %v451_v47 }
 0x62c   :  { %v1216_v48 = vpop.eup %1215 }
 0x62d   :  { %459 = vrot.lane.b32.xlu2 %v1216_v48, %s1413_s21 }
 0x687   :  { %v460_v53 = vpop.permute.xlu2 %459  ;;  %v462_v54 = vpop.permute.xlu0 %461 }
 0x688   :  { %v465_v56 = vmul.f32 %v460_v53, %v455_v49  ;;  %v466_v58 = vmul.f32 %v462_v54, %v456_v51 }
 0x68a   :  { %v1555_v59 = vadd.f32 %v471_v55, %v465_v56  ;;  %v1557_v60 = vadd.f32 %v472_v57, %v466_v58 }
 0x68c   :  { %v486_v0 = vrot.slane %v1555_v59, 2  ;;  %v487_v1 = vrot.slane %v1557_v60, 1  ;;  %v591_v51 = vrot.slane %v1557_v60, 7  ;;  %v590_v53 = vrot.slane %v1555_v59, 7 }
 0x68e   :  { %v488_v2 = vsel %vm244_vm10, %v487_v1, %v486_v0 }
 0x68f   :  { %489 = vrot.lane.b32.xlu1 %v488_v2, %s1413_s21 }
 0x701   :  { %v490_v3 = vpop.permute.xlu1 %489 }
 0x702   :  { %1154 = vmatmul.msk.f32.vlgmr.msrb.gmra.mxu1 %vm121_vm1, %v490_v3 }
 0x77f   :  { %v510_v6 = vpop.f32.mrf.mxu1 }
 0x780   :  { %v511_v7 = vadd.f32 %v1486_v9, %v510_v6 }
 0x782   :  { %v514_v8 = vrot.slane %v511_v7, 5  ;;  %v515_v4 = vrot.slane %v511_v7, 6 }
 0x784   :  { %560 = vrot.lane.b32.xlu0 %v515_v4, %s1411_s18  ;;  %558 = vrot.lane.b32.xlu2 %v514_v8, %s1411_s18  ;;  %v518_v10 = vadd.f32 %v514_v8, %v1497_v18  ;;  %v519_v14 = vadd.f32 %v515_v4, %v1494_v16 }
 0x786   :  { %v1155_v11 = vmul.f32 -1.442695, %v518_v10  ;;  %v1156_v17 = vmul.f32 -1.442695, %v519_v14 }
 0x788   :  { %1217 = vpow2.f32 %v1155_v11 }
 0x78e   :  { %v1218_v12 = vpop.eup %1217 }
 0x78f   :  { %v526_v13 = vadd.f32 1.0, %v1218_v12 }
 0x791   :  { %1219 = vrcp.f32 %v526_v13  ;;  %v539_v25 = vand.u32 2147483648, %v526_v13  ;;  %vm533_vm14 = vweird.f32 %v526_v13  ;;  %v537_v26 = vand.u32 2147483647, %v526_v13 }
 0x792   :  { %1221 = vpow2.f32 %v1156_v17 }
 0x793   :  { %v540_v28 = vor.u32 1.1754944e-38, %v539_v25  ;;  %vm538_vm0 = vcmp.eq.f32.partialorder %v537_v26, 8.507059e+37 }
 0x797   :  { %v1220_v15 = vpop.eup %1219 }
 0x798   :  { %v529_v19 = vmul.f32 %v1220_v15, %v526_v13  ;;  %v1222_v21 = vpop.eup %1221  ;;  %vm534_vm13 = vweird.f32 %v1220_v15 }
 0x799   :  { %v527_v23 = vadd.f32 1.0, %v1222_v21  ;;  %vm535_vm15 = vmor %vm533_vm14, %vm534_vm13 }
 0x79a   :  { %v530_v20 = vsub.f32 1.0, %v529_v19 }
 0x79b   :  { %1223 = vrcp.f32 %v527_v23  ;;  %v554_v37 = vand.u32 2147483648, %v527_v23  ;;  %vm548_vm3 = vweird.f32 %v527_v23  ;;  %v552_v38 = vand.u32 2147483647, %v527_v23 }
 0x79c   :  { %v531_v22 = vmul.f32 %v1220_v15, %v530_v20 }
 0x79d   :  { %v555_v40 = vor.u32 1.1754944e-38, %v554_v37  ;;  %vm553_vm5 = vcmp.eq.f32.partialorder %v552_v38, 8.507059e+37 }
 0x79e   :  { %v532_v24 = vadd.f32 %v1220_v15, %v531_v22 }
 0x7a0   :  { %v536_v27 = vsel %vm535_vm15, %v1220_v15, %v532_v24 }
 0x7a1   :  { %v541_v30 = vsel %vm538_vm0, %v540_v28, %v536_v27  ;;  %v1224_v32 = vpop.eup %1223 }
 0x7a2   :  { %v544_v33 = vmul.f32 %v1224_v32, %v527_v23  ;;  %vm549_vm2 = vweird.f32 %v1224_v32  ;;  %v578_v52 = vsub.f32 1.0, %v541_v30  ;;  %v594_v58 = vmul.f32 %v590_v53, %v541_v30 }
 0x7a3   :  { %vm550_vm4 = vmor %vm548_vm3, %vm549_vm2 }
 0x7a4   :  { %v545_v34 = vsub.f32 1.0, %v544_v33 }
 0x7a6   :  { %v546_v35 = vmul.f32 %v1224_v32, %v545_v34 }
 0x7a8   :  { %v547_v36 = vadd.f32 %v1224_v32, %v546_v35 }
 0x7aa   :  { %v551_v39 = vsel %vm550_vm4, %v1224_v32, %v547_v36 }
 0x7ab   :  { %v556_v42 = vsel %vm553_vm5, %v555_v40, %v551_v39 }
 0x7ac   :  { %v579_v50 = vsub.f32 1.0, %v556_v42  ;;  %v595_v56 = vmul.f32 %v591_v51, %v556_v42 }
 0x7de   :  { %v559_v29 = vpop.permute.xlu2 %558 }
 0x7df   :  { %v564_v31 = vmul.f32 %v559_v29, %v541_v30 }
 0x7e1   :  { %568 = vrot.lane.b32.xlu1 %v564_v31, %s1411_s18 }
 0x7f6   :  { %v561_v41 = vpop.permute.xlu0 %560 }
 0x7f7   :  { %v565_v43 = vmul.f32 %v561_v41, %v556_v42 }
 0x7f9   :  { %570 = vrot.lane.b32.xlu2 %v565_v43, %s1411_s18 }
 0x853   :  { %v571_v44 = vpop.permute.xlu2 %570  ;;  %v569_v45 = vpop.permute.xlu1 %568 }
 0x854   :  { %v575_v46 = vadd.f32 %v571_v44, %v1494_v16  ;;  %v574_v47 = vadd.f32 %v569_v45, %v1497_v18 }
 0x856   :  { %1225 = vtanh.f32 %v575_v46 }
 0x857   :  { %1227 = vtanh.f32 %v574_v47 }
 0x85c   :  { %v1226_v48 = vpop.eup %1225 }
 0x85d   :  { %v1228_v49 = vpop.eup %1227  ;;  %584 = vrot.lane.b32.xlu1 %v1226_v48, %s1413_s21 }
 0x85e   :  { %582 = vrot.lane.b32.xlu0 %v1228_v49, %s1413_s21 }
 0x8cf   :  { %v585_v54 = vpop.permute.xlu1 %584 }
 0x8d0   :  { %v583_v55 = vpop.permute.xlu0 %582  ;;  %v589_v57 = vmul.f32 %v585_v54, %v579_v50 }
 0x8d1   :  { %v588_v0 = vmul.f32 %v583_v55, %v578_v52 }
 0x8d2   :  { %v1577_v1 = vadd.f32 %v595_v56, %v589_v57 }
 0x8d3   :  { %v1579_v2 = vadd.f32 %v594_v58, %v588_v0 }
 0x8d4   :  { %v610_v3 = vrot.slane %v1577_v1, 2  ;;  %v714_v56 = vrot.slane %v1577_v1, 7 }
 0x8d5   :  { %v609_v6 = vrot.slane %v1579_v2, 3  ;;  %v713_v54 = vrot.slane %v1579_v2, 7 }
 0x8d7   :  { %v611_v7 = vsel %vm244_vm10, %v610_v3, %v609_v6 }
 0x8d8   :  { %612 = vrot.lane.b32.xlu2 %v611_v7, %s1413_s21 }
 0x932   :  { %v613_v8 = vpop.permute.xlu2 %612 }
 0x933   :  { %1157 = vmatmul.msk.f32.vlgmr.msrb.gmra.mxu2 %vm121_vm1, %v613_v8 }
 0x9b6   :  { %v633_v4 = vpop.f32.mrf.mxu2 }
 0x9b7   :  { %v634_v10 = vadd.f32 %v1486_v9, %v633_v4 }
 0x9b9   :  { %v637_v11 = vrot.slane %v634_v10, 4  ;;  %v638_v12 = vrot.slane %v634_v10, 5 }
 0x9bb   :  { %683 = vrot.lane.b32.xlu1 %v638_v12, %s1411_s18  ;;  %681 = vrot.lane.b32.xlu0 %v637_v11, %s1411_s18  ;;  %v641_v13 = vadd.f32 %v637_v11, %v1497_v18  ;;  %v642_v14 = vadd.f32 %v638_v12, %v1494_v16 }
 0x9bd   :  { %v1158_v15 = vmul.f32 -1.442695, %v641_v13  ;;  %v1159_v17 = vmul.f32 -1.442695, %v642_v14 }
 0x9bf   :  { %1229 = vpow2.f32 %v1158_v15 }
 0x9c0   :  { %1231 = vpow2.f32 %v1159_v17 }
 0x9c5   :  { %v1230_v19 = vpop.eup %1229 }
 0x9c6   :  { %v1232_v20 = vpop.eup %1231  ;;  %v649_v21 = vadd.f32 1.0, %v1230_v19 }
 0x9c7   :  { %v650_v22 = vadd.f32 1.0, %v1232_v20 }
 0x9c8   :  { %1233 = vrcp.f32 %v649_v21  ;;  %vm656_vm8 = vweird.f32 %v649_v21  ;;  %v662_v34 = vand.u32 2147483648, %v649_v21  ;;  %v660_v36 = vand.u32 2147483647, %v649_v21 }
 0x9c9   :  { %1235 = vrcp.f32 %v650_v22  ;;  %v677_v33 = vand.u32 2147483648, %v650_v22  ;;  %vm671_vm9 = vweird.f32 %v650_v22  ;;  %v675_v35 = vand.u32 2147483647, %v650_v22 }
 0x9ca   :  { %v663_v40 = vor.u32 1.1754944e-38, %v662_v34  ;;  %vm661_vm14 = vcmp.eq.f32.partialorder %v660_v36, 8.507059e+37 }
 0x9cb   :  { %v678_v39 = vor.u32 1.1754944e-38, %v677_v33  ;;  %vm676_vm13 = vcmp.eq.f32.partialorder %v675_v35, 8.507059e+37 }
 0x9ce   :  { %v1234_v23 = vpop.eup %1233 }
 0x9cf   :  { %v1236_v24 = vpop.eup %1235  ;;  %v652_v26 = vmul.f32 %v1234_v23, %v649_v21  ;;  %vm657_vm6 = vweird.f32 %v1234_v23 }
 0x9d0   :  { %v667_v25 = vmul.f32 %v1236_v24, %v650_v22  ;;  %vm672_vm7 = vweird.f32 %v1236_v24  ;;  %vm658_vm11 = vmor %vm656_vm8, %vm657_vm6 }
 0x9d1   :  { %v653_v28 = vsub.f32 1.0, %v652_v26  ;;  %vm673_vm12 = vmor %vm671_vm9, %vm672_vm7 }
 0x9d2   :  { %v668_v27 = vsub.f32 1.0, %v667_v25 }
 0x9d3   :  { %v654_v30 = vmul.f32 %v1234_v23, %v653_v28 }
 0x9d4   :  { %v669_v29 = vmul.f32 %v1236_v24, %v668_v27 }
 0x9d5   :  { %v655_v32 = vadd.f32 %v1234_v23, %v654_v30 }
 0x9d6   :  { %v670_v31 = vadd.f32 %v1236_v24, %v669_v29 }
 0x9d7   :  { %v659_v38 = vsel %vm658_vm11, %v1234_v23, %v655_v32 }
 0x9d8   :  { %v674_v37 = vsel %vm673_vm12, %v1236_v24, %v670_v31  ;;  %v664_v44 = vsel %vm661_vm14, %v663_v40, %v659_v38 }
 0x9d9   :  { %v679_v42 = vsel %vm676_vm13, %v678_v39, %v674_v37  ;;  %v701_v53 = vsub.f32 1.0, %v664_v44  ;;  %v717_v0 = vmul.f32 %v713_v54, %v664_v44 }
 0x9da   :  { %v702_v55 = vsub.f32 1.0, %v679_v42  ;;  %v718_v6 = vmul.f32 %v714_v56, %v679_v42 }
 0xa2d   :  { %v684_v41 = vpop.permute.xlu1 %683  ;;  %v682_v43 = vpop.permute.xlu0 %681 }
 0xa2e   :  { %v688_v45 = vmul.f32 %v684_v41, %v679_v42  ;;  %v687_v46 = vmul.f32 %v682_v43, %v664_v44 }
 0xa30   :  { %693 = vrot.lane.b32.xlu0 %v688_v45, %s1411_s18  ;;  %691 = vrot.lane.b32.xlu2 %v687_v46, %s1411_s18 }
 0xa8a   :  { %v692_v47 = vpop.permute.xlu2 %691 }
 0xa8b   :  { %v697_v48 = vadd.f32 %v692_v47, %v1497_v18 }
 0xa8d   :  { %1237 = vtanh.f32 %v697_v48 }
 0xa93   :  { %v1238_v49 = vpop.eup %1237 }
 0xa94   :  { %705 = vrot.lane.b32.xlu1 %v1238_v49, %s1413_s21 }
 0xaa2   :  { %v694_v50 = vpop.permute.xlu0 %693 }
 0xaa3   :  { %v698_v51 = vadd.f32 %v694_v50, %v1494_v16 }
 0xaa5   :  { %1239 = vtanh.f32 %v698_v51 }
 0xaab   :  { %v1240_v52 = vpop.eup %1239 }
 0xaac   :  { %707 = vrot.lane.b32.xlu2 %v1240_v52, %s1413_s21 }
 0xb06   :  { %v706_v57 = vpop.permute.xlu1 %705  ;;  %v708_v58 = vpop.permute.xlu2 %707 }
 0xb07   :  { %v711_v3 = vmul.f32 %v706_v57, %v701_v53  ;;  %v712_v7 = vmul.f32 %v708_v58, %v702_v55 }
 0xb09   :  { %v1599_v8 = vadd.f32 %v717_v0, %v711_v3  ;;  %v1601_v4 = vadd.f32 %v718_v6, %v712_v7 }
 0xb0b   :  { %v732_v10 = vrot.slane %v1599_v8, 4  ;;  %v733_v11 = vrot.slane %v1601_v4, 3  ;;  %v836_v0 = vrot.slane %v1599_v8, 7  ;;  %v837_v6 = vrot.slane %v1601_v4, 7 }
 0xb0d   :  { %v734_v12 = vsel %vm244_vm10, %v733_v11, %v732_v10 }
 0xb0e   :  { %735 = vrot.lane.b32.xlu0 %v734_v12, %s1413_s21 }
 0xb80   :  { %v736_v13 = vpop.permute.xlu0 %735 }
 0xb81   :  { %1160 = vmatmul.msk.f32.vlgmr.msrb.gmra.mxu3 %vm121_vm1, %v736_v13 }
 0xc04   :  { %v756_v14 = vpop.f32.mrf.mxu3 }
 0xc05   :  { %v757_v15 = vadd.f32 %v1486_v9, %v756_v14 }
 0xc07   :  { %v760_v17 = vrot.slane %v757_v15, 3  ;;  %v761_v19 = vrot.slane %v757_v15, 4 }
 0xc09   :  { %806 = vrot.lane.b32.xlu2 %v761_v19, %s1411_s18  ;;  %804 = vrot.lane.b32.xlu1 %v760_v17, %s1411_s18  ;;  %v765_v20 = vadd.f32 %v761_v19, %v1494_v16  ;;  %v764_v24 = vadd.f32 %v760_v17, %v1497_v18 }
 0xc0b   :  { %v1162_v21 = vmul.f32 -1.442695, %v765_v20  ;;  %v1161_v26 = vmul.f32 -1.442695, %v764_v24 }
 0xc0d   :  { %1241 = vpow2.f32 %v1162_v21 }
 0xc13   :  { %v1242_v22 = vpop.eup %1241 }
 0xc14   :  { %v773_v23 = vadd.f32 1.0, %v1242_v22 }
 0xc16   :  { %1243 = vrcp.f32 %v773_v23  ;;  %v800_v33 = vand.u32 2147483648, %v773_v23  ;;  %vm794_vm0 = vweird.f32 %v773_v23  ;;  %v798_v34 = vand.u32 2147483647, %v773_v23 }
 0xc17   :  { %1245 = vpow2.f32 %v1161_v26 }
 0xc18   :  { %v801_v36 = vor.u32 1.1754944e-38, %v800_v33  ;;  %vm799_vm3 = vcmp.eq.f32.partialorder %v798_v34, 8.507059e+37 }
 0xc1c   :  { %v1244_v25 = vpop.eup %1243 }
 0xc1d   :  { %v790_v27 = vmul.f32 %v1244_v25, %v773_v23  ;;  %v1246_v29 = vpop.eup %1245  ;;  %vm795_vm15 = vweird.f32 %v1244_v25 }
 0xc1e   :  { %v772_v31 = vadd.f32 1.0, %v1246_v29  ;;  %vm796_vm2 = vmor %vm794_vm0, %vm795_vm15 }
 0xc1f   :  { %v791_v28 = vsub.f32 1.0, %v790_v27 }
 0xc20   :  { %1247 = vrcp.f32 %v772_v31  ;;  %v785_v45 = vand.u32 2147483648, %v772_v31  ;;  %vm779_vm5 = vweird.f32 %v772_v31  ;;  %v783_v46 = vand.u32 2147483647, %v772_v31 }
 0xc21   :  { %v792_v30 = vmul.f32 %v1244_v25, %v791_v28 }
 0xc22   :  { %v786_v48 = vor.u32 1.1754944e-38, %v785_v45  ;;  %vm784_vm7 = vcmp.eq.f32.partialorder %v783_v46, 8.507059e+37 }
 0xc23   :  { %v793_v32 = vadd.f32 %v1244_v25, %v792_v30 }
 0xc25   :  { %v797_v35 = vsel %vm796_vm2, %v1244_v25, %v793_v32 }
 0xc26   :  { %v802_v38 = vsel %vm799_vm3, %v801_v36, %v797_v35  ;;  %v1248_v40 = vpop.eup %1247 }
 0xc27   :  { %v775_v41 = vmul.f32 %v1248_v40, %v772_v31  ;;  %vm780_vm4 = vweird.f32 %v1248_v40  ;;  %v825_v3 = vsub.f32 1.0, %v802_v38  ;;  %v841_v13 = vmul.f32 %v837_v6, %v802_v38 }
 0xc28   :  { %vm781_vm6 = vmor %vm779_vm5, %vm780_vm4 }
 0xc29   :  { %v776_v42 = vsub.f32 1.0, %v775_v41 }
 0xc2b   :  { %v777_v43 = vmul.f32 %v1248_v40, %v776_v42 }
 0xc2d   :  { %v778_v44 = vadd.f32 %v1248_v40, %v777_v43 }
 0xc2f   :  { %v782_v47 = vsel %vm781_vm6, %v1248_v40, %v778_v44 }
 0xc30   :  { %v787_v50 = vsel %vm784_vm7, %v786_v48, %v782_v47 }
 0xc31   :  { %v824_v58 = vsub.f32 1.0, %v787_v50  ;;  %v840_v11 = vmul.f32 %v836_v0, %v787_v50 }
 0xc63   :  { %v807_v37 = vpop.permute.xlu2 %806 }
 0xc64   :  { %v811_v39 = vmul.f32 %v807_v37, %v802_v38 }
 0xc66   :  { %816 = vrot.lane.b32.xlu1 %v811_v39, %s1411_s18 }
 0xc7b   :  { %v805_v49 = vpop.permute.xlu1 %804 }
 0xc7c   :  { %v810_v51 = vmul.f32 %v805_v49, %v787_v50 }
 0xc7e   :  { %814 = vrot.lane.b32.xlu0 %v810_v51, %s1411_s18 }
 0xcd8   :  { %v817_v52 = vpop.permute.xlu1 %816 }
 0xcd9   :  { %v821_v53 = vadd.f32 %v817_v52, %v1494_v16 }
 0xcdb   :  { %1249 = vtanh.f32 %v821_v53 }
 0xce1   :  { %v1250_v54 = vpop.eup %1249 }
 0xce2   :  { %830 = vrot.lane.b32.xlu0 %v1250_v54, %s1413_s21 }
 0xcf0   :  { %v815_v55 = vpop.permute.xlu0 %814 }
 0xcf1   :  { %v820_v56 = vadd.f32 %v815_v55, %v1497_v18 }
 0xcf3   :  { %1251 = vtanh.f32 %v820_v56 }
 0xcf9   :  { %v1252_v57 = vpop.eup %1251 }
 0xcfa   :  { %828 = vrot.lane.b32.xlu2 %v1252_v57, %s1413_s21 }
 0xd54   :  { %v829_v7 = vpop.permute.xlu2 %828  ;;  %v831_v10 = vpop.permute.xlu0 %830 }
 0xd55   :  { %v834_v12 = vmul.f32 %v829_v7, %v824_v58  ;;  %v835_v14 = vmul.f32 %v831_v10, %v825_v3 }
 0xd57   :  { %v1621_v15 = vadd.f32 %v840_v11, %v834_v12  ;;  %v1623_v17 = vadd.f32 %v841_v13, %v835_v14 }
 0xd59   :  { %v855_v19 = vrot.slane %v1621_v15, 5  ;;  %v856_v20 = vrot.slane %v1623_v17, 4  ;;  %v960_v12 = vrot.slane %v1623_v17, 7  ;;  %v959_v14 = vrot.slane %v1621_v15, 7 }
 0xd5b   :  { %v857_v21 = vsel %vm244_vm10, %v856_v20, %v855_v19 }
 0xd5c   :  { %858 = vrot.lane.b32.xlu1 %v857_v21, %s1413_s21 }
 0xdce   :  { %v859_v22 = vpop.permute.xlu1 %858 }
 0xdcf   :  { %1163 = vmatmul.msk.f32.vlgmr.msrb.gmra.mxu0 %vm121_vm1, %v859_v22 }
 0xe4c   :  { %v879_v23 = vpop.f32.mrf.mxu0 }
 0xe4d   :  { %v880_v24 = vadd.f32 %v1486_v9, %v879_v23 }
 0xe4f   :  { %v883_v25 = vrot.slane %v880_v24, 2  ;;  %v884_v26 = vrot.slane %v880_v24, 3 }
 0xe51   :  { %929 = vrot.lane.b32.xlu0 %v884_v26, %s1411_s18  ;;  %927 = vrot.lane.b32.xlu2 %v883_v25, %s1411_s18  ;;  %v887_v27 = vadd.f32 %v883_v25, %v1497_v18  ;;  %v888_v31 = vadd.f32 %v884_v26, %v1494_v16 }
 0xe53   :  { %v1164_v28 = vmul.f32 -1.442695, %v887_v27  ;;  %v1165_v33 = vmul.f32 -1.442695, %v888_v31 }
 0xe55   :  { %1253 = vpow2.f32 %v1164_v28 }
 0xe5b   :  { %v1254_v29 = vpop.eup %1253 }
 0xe5c   :  { %v895_v30 = vadd.f32 1.0, %v1254_v29 }
 0xe5e   :  { %1255 = vrcp.f32 %v895_v30  ;;  %v908_v39 = vand.u32 2147483648, %v895_v30  ;;  %vm902_vm9 = vweird.f32 %v895_v30  ;;  %v906_v40 = vand.u32 2147483647, %v895_v30 }
 0xe5f   :  { %1257 = vpow2.f32 %v1165_v33 }
 0xe60   :  { %v909_v42 = vor.u32 1.1754944e-38, %v908_v39  ;;  %vm907_vm12 = vcmp.eq.f32.partialorder %v906_v40, 8.507059e+37 }
 0xe64   :  { %v1256_v32 = vpop.eup %1255 }
 0xe65   :  { %v898_v34 = vmul.f32 %v1256_v32, %v895_v30  ;;  %v1258_v35 = vpop.eup %1257  ;;  %vm903_vm8 = vweird.f32 %v1256_v32 }
 0xe66   :  { %v896_v37 = vadd.f32 1.0, %v1258_v35  ;;  %vm904_vm11 = vmor %vm902_vm9, %vm903_vm8  ;;  %vm240_vm8 = vcmask 253952   ;;  %vm361_vm9 = vcmask 254977  }
 0xe67   :  { %v899_v9 = vsub.f32 1.0, %v898_v34 }
 0xe68   :  { %1259 = vrcp.f32 %v896_v37  ;;  %v923_v51 = vand.u32 2147483648, %v896_v37  ;;  %vm917_vm14 = vweird.f32 %v896_v37  ;;  %v921_v52 = vand.u32 2147483647, %v896_v37 }
 0xe69   :  { %v900_v36 = vmul.f32 %v1256_v32, %v899_v9 }
 0xe6a   :  { %v924_v54 = vor.u32 1.1754944e-38, %v923_v51  ;;  %vm922_vm0 = vcmp.eq.f32.partialorder %v921_v52, 8.507059e+37 }
 0xe6b   :  { %v901_v38 = vadd.f32 %v1256_v32, %v900_v36 }
 0xe6d   :  { %v905_v41 = vsel %vm904_vm11, %v1256_v32, %v901_v38  ;;  %v1277_v32 = vld [vmem:[%s1722_s4] ss:$0 sm:$0xff]  ;;  %vm606_vm11 = vcmask 257027   ;;  %s1414_s4 = smov [#allocation8]  }
 0xe6e   :  { %v910_v44 = vsel %vm907_vm12, %v909_v42, %v905_v41  ;;  %v1260_v46 = vpop.eup %1259  ;;  %vm729_vm12 = vcmask 258052   ;;  %s1111_s24 = sshll.u32 %s1414_s4, 4  ;;  %s1112_s24 = int_to_ptr.vmem [resolvable:$true] %s1111_s24 }
 0xe6f   :  { %v913_v47 = vmul.f32 %v1260_v46, %v896_v37  ;;  %vm918_vm13 = vweird.f32 %v1260_v46  ;;  %v947_v13 = vsub.f32 1.0, %v910_v44  ;;  %v963_v23 = vmul.f32 %v959_v14, %v910_v44 }
 0xe70   :  { %vm919_vm15 = vmor %vm917_vm14, %vm918_vm13  ;;  %vm975_vm13 = vcmask 260102   ;;  %vm483_vm14 = vcmask 256002  }
 0xe71   :  { %v914_v48 = vsub.f32 1.0, %v913_v47 }
 0xe73   :  { %v915_v49 = vmul.f32 %v1260_v46, %v914_v48 }
 0xe75   :  { %v916_v50 = vadd.f32 %v1260_v46, %v915_v49 }
 0xe77   :  { %v920_v53 = vsel %vm919_vm15, %v1260_v46, %v916_v50  ;;  %vm852_vm15 = vcmask 259077  }
 0xe78   :  { %v925_v56 = vsel %vm922_vm0, %v924_v54, %v920_v53  ;;  %vm1098_vm0 = vcmask 261127  }
 0xe79   :  { %v948_v11 = vsub.f32 1.0, %v925_v56  ;;  %v964_v21 = vmul.f32 %v960_v12, %v925_v56 }
 0xeab   :  { %v928_v43 = vpop.permute.xlu2 %927 }
 0xeac   :  { %v933_v45 = vmul.f32 %v928_v43, %v910_v44 }
 0xeae   :  { %937 = vrot.lane.b32.xlu1 %v933_v45, %s1411_s18 }
 0xec3   :  { %v930_v55 = vpop.permute.xlu0 %929 }
 0xec4   :  { %v934_v57 = vmul.f32 %v930_v55, %v925_v56 }
 0xec6   :  { %939 = vrot.lane.b32.xlu2 %v934_v57, %s1411_s18 }
 0xf20   :  { %v940_v58 = vpop.permute.xlu2 %939  ;;  %v938_v0 = vpop.permute.xlu1 %937 }
 0xf21   :  { %v944_v3 = vadd.f32 %v940_v58, %v1494_v16  ;;  %v943_v6 = vadd.f32 %v938_v0, %v1497_v18 }
 0xf23   :  { %1261 = vtanh.f32 %v944_v3 }
 0xf24   :  { %1263 = vtanh.f32 %v943_v6 }
 0xf29   :  { %v1262_v7 = vpop.eup %1261 }
 0xf2a   :  { %v1264_v10 = vpop.eup %1263  ;;  %953 = vrot.lane.b32.xlu1 %v1262_v7, %s1413_s21 }
 0xf2b   :  { %951 = vrot.lane.b32.xlu0 %v1264_v10, %s1413_s21 }
 0xf9c   :  { %v954_v19 = vpop.permute.xlu1 %953 }
 0xf9d   :  { %v952_v20 = vpop.permute.xlu0 %951  ;;  %v958_v22 = vmul.f32 %v954_v19, %v948_v11 }
 0xf9e   :  { %v957_v24 = vmul.f32 %v952_v20, %v947_v13 }
 0xf9f   :  { %v1643_v25 = vadd.f32 %v964_v21, %v958_v22 }
 0xfa0   :  { %v1645_v26 = vadd.f32 %v963_v23, %v957_v24 }
 0xfa1   :  { %v979_v27 = vrot.slane %v1643_v25, 5 }
 0xfa2   :  { %v978_v28 = vrot.slane %v1645_v26, 6 }
 0xfa4   :  { %v980_v29 = vsel %vm244_vm10, %v979_v27, %v978_v28 }
 0xfa5   :  { %981 = vrot.lane.b32.xlu2 %v980_v29, %s1413_s21 }
 0xfff   :  { %v982_v30 = vpop.permute.xlu2 %981 }
0x1000   :  { %1166 = vmatmul.msk.f32.vlgmr.msra.gmra.mxu1 %vm121_vm1, %v982_v30 }
0x107d   :  { %v1002_v31 = vpop.f32.mrf.mxu1 }
0x107e   :  { %v1003_v33 = vadd.f32 %v1277_v32, %v1002_v31 }
0x1080   :  { %v1006_v34 = vrot.slane %v1003_v33, 1  ;;  %v1007_v9 = vrot.slane %v1003_v33, 2 }
0x1082   :  { %1052 = vrot.lane.b32.xlu0 %v1007_v9, %s1411_s18  ;;  %1050 = vrot.lane.b32.xlu1 %v1006_v34, %s1411_s18  ;;  %v1010_v35 = vadd.f32 %v1006_v34, %v1497_v18  ;;  %v1011_v36 = vadd.f32 %v1007_v9, %v1494_v16 }
0x1084   :  { %v1167_v37 = vmul.f32 -1.442695, %v1010_v35  ;;  %v1168_v38 = vmul.f32 -1.442695, %v1011_v36 }
0x1086   :  { %1265 = vpow2.f32 %v1167_v37 }
0x1087   :  { %1267 = vpow2.f32 %v1168_v38 }
0x108c   :  { %v1266_v39 = vpop.eup %1265 }
0x108d   :  { %v1268_v40 = vpop.eup %1267  ;;  %v1018_v41 = vadd.f32 1.0, %v1266_v39 }
0x108e   :  { %v1019_v42 = vadd.f32 1.0, %v1268_v40 }
0x108f   :  { %1269 = vrcp.f32 %v1018_v41  ;;  %vm1025_vm2 = vweird.f32 %v1018_v41  ;;  %v1031_v54 = vand.u32 2147483648, %v1018_v41  ;;  %v1029_v56 = vand.u32 2147483647, %v1018_v41 }
0x1090   :  { %1271 = vrcp.f32 %v1019_v42  ;;  %v1046_v53 = vand.u32 2147483648, %v1019_v42  ;;  %vm1040_vm3 = vweird.f32 %v1019_v42  ;;  %v1044_v55 = vand.u32 2147483647, %v1019_v42 }
0x1091   :  { %v1032_v3 = vor.u32 1.1754944e-38, %v1031_v54  ;;  %vm1030_vm7 = vcmp.eq.f32.partialorder %v1029_v56, 8.507059e+37 }
0x1092   :  { %v1047_v0 = vor.u32 1.1754944e-38, %v1046_v53  ;;  %vm1045_vm6 = vcmp.eq.f32.partialorder %v1044_v55, 8.507059e+37 }
0x1095   :  { %v1270_v43 = vpop.eup %1269 }
0x1096   :  { %v1272_v44 = vpop.eup %1271  ;;  %v1021_v46 = vmul.f32 %v1270_v43, %v1018_v41  ;;  %vm1026_vm1 = vweird.f32 %v1270_v43 }
0x1097   :  { %v1036_v45 = vmul.f32 %v1272_v44, %v1019_v42  ;;  %vm1041_vm10 = vweird.f32 %v1272_v44  ;;  %vm1027_vm4 = vmor %vm1025_vm2, %vm1026_vm1 }
0x1098   :  { %v1022_v48 = vsub.f32 1.0, %v1021_v46  ;;  %vm1042_vm5 = vmor %vm1040_vm3, %vm1041_vm10 }
0x1099   :  { %v1037_v47 = vsub.f32 1.0, %v1036_v45 }
0x109a   :  { %v1023_v50 = vmul.f32 %v1270_v43, %v1022_v48 }
0x109b   :  { %v1038_v49 = vmul.f32 %v1272_v44, %v1037_v47 }
0x109c   :  { %v1024_v52 = vadd.f32 %v1270_v43, %v1023_v50 }
0x109d   :  { %v1039_v51 = vadd.f32 %v1272_v44, %v1038_v49 }
0x109e   :  { %v1028_v58 = vsel %vm1027_vm4, %v1270_v43, %v1024_v52 }
0x109f   :  { %v1043_v57 = vsel %vm1042_vm5, %v1272_v44, %v1039_v51  ;;  %v1033_v11 = vsel %vm1030_vm7, %v1032_v3, %v1028_v58 }
0x10a0   :  { %v1048_v7 = vsel %vm1045_vm6, %v1047_v0, %v1043_v57 }
0x10f4   :  { %v1053_v6 = vpop.permute.xlu0 %1052  ;;  %v1051_v10 = vpop.permute.xlu1 %1050 }
0x10f5   :  { %v1057_v12 = vmul.f32 %v1053_v6, %v1048_v7  ;;  %v1056_v13 = vmul.f32 %v1051_v10, %v1033_v11 }
0x10f7   :  { %1062 = vrot.lane.b32.xlu2 %v1057_v12, %s1411_s18  ;;  %1060 = vrot.lane.b32.xlu0 %v1056_v13, %s1411_s18 }
0x10ff   :  { %234 = vrot.lane.b32.xlu0 %v1511_v5, %s1413_s21 }
0x1107   :  { %357 = vrot.lane.b32.xlu0 %v1535_v62, %s1413_s21 }
0x110f   :  { %600 = vrot.lane.b32.xlu0 %v1579_v2, %s1413_s21 }
0x1117   :  { %725 = vrot.lane.b32.xlu0 %v1601_v4, %s1413_s21 }
0x111f   :  { %969 = vrot.lane.b32.xlu0 %v1645_v26, %s1413_s21 }
0x1151   :  { %v1063_v14 = vpop.permute.xlu2 %1062 }
0x1152   :  { %v1067_v19 = vadd.f32 %v1063_v14, %v1494_v16 }
0x1154   :  { %1273 = vtanh.f32 %v1067_v19 }
0x115a   :  { %v1274_v20 = vpop.eup %1273 }
0x115b   :  { %1076 = vrot.lane.b32.xlu1 %v1274_v20, %s1413_s21 }
0x1163   :  { %236 = vrot.lane.b32.xlu1 %v1508_v63, %s1413_s21 }
0x1169   :  { %v1061_v5 = vpop.permute.xlu0 %1060 }
0x116a   :  { %v1066_v62 = vadd.f32 %v1061_v5, %v1497_v18 }
0x116b   :  { %477 = vrot.lane.b32.xlu1 %v1555_v59, %s1413_s21 }
0x116c   :  { %1275 = vtanh.f32 %v1066_v62 }
0x1171   :  { %v235_v2 = vpop.permute.xlu0 %234 }
0x1172   :  { %v1276_v4 = vpop.eup %1275  ;;  %241 = vst.msk [vmem:[#allocation8] sm:$0x1] %vm240_vm8, %v235_v2 }
0x1173   :  { %602 = vrot.lane.b32.xlu1 %v1577_v1, %s1413_s21  ;;  %1074 = vrot.lane.b32.xlu2 %v1276_v4, %s1413_s21  ;;  %v1083_v1 = vrot.slane %v1643_v25, 7 }
0x1175   :  { %v1087_v23 = vmul.f32 %v1083_v1, %v1048_v7 }
0x1179   :  { %v358_v16 = vpop.permute.xlu0 %357 }
0x117a   :  { %363 = vst.msk [vmem:[#allocation8 + $0x8] sm:$0x2] %vm361_vm9, %v358_v16 }
0x117b   :  { %846 = vrot.lane.b32.xlu1 %v1621_v15, %s1413_s21  ;;  %355 = vrot.lane.b32.xlu2 %v1533_v61, %s1413_s21  ;;  %v1071_v61 = vsub.f32 1.0, %v1048_v7  ;;  %v1070_v15 = vsub.f32 1.0, %v1033_v11 }
0x1181   :  { %v601_v18 = vpop.permute.xlu0 %600 }
0x1182   :  { %607 = vst.msk [vmem:[#allocation8] sm:$0x8] %vm606_vm11, %v601_v18 }
0x1183   :  { %971 = vrot.lane.b32.xlu1 %v1643_v25, %s1413_s21  ;;  %479 = vrot.lane.b32.xlu2 %v1557_v60, %s1413_s21  ;;  %v1082_v60 = vrot.slane %v1645_v26, 7 }
0x1185   :  { %v1086_v27 = vmul.f32 %v1082_v60, %v1033_v11 }
0x1189   :  { %v726_v63 = vpop.permute.xlu0 %725 }
0x118a   :  { %731 = vst.msk [vmem:[#allocation8 + $0x8] sm:$0x10] %vm729_vm12, %v726_v63 }
0x118b   :  { %723 = vrot.lane.b32.xlu2 %v1599_v8, %s1413_s21 }
0x1191   :  { %v970_v59 = vpop.permute.xlu0 %969 }
0x1192   :  { %976 = vst.msk [vmem:[#allocation8] sm:$0x40] %vm975_vm13, %v970_v59 }
0x1193   :  { %848 = vrot.lane.b32.xlu2 %v1623_v17, %s1413_s21 }
0x11cd   :  { %v1077_v21 = vpop.permute.xlu1 %1076  ;;  %v1075_v22 = vpop.permute.xlu2 %1074 }
0x11ce   :  { %v1081_v24 = vmul.f32 %v1077_v21, %v1071_v61  ;;  %v1080_v28 = vmul.f32 %v1075_v22, %v1070_v15 }
0x11d0   :  { %v1089_v8 = vadd.f32 %v1087_v23, %v1081_v24  ;;  %v1088_v29 = vadd.f32 %v1086_v27, %v1080_v28 }
0x11d2   :  { %1094 = vrot.lane.b32.xlu0 %v1089_v8, %s1413_s21  ;;  %1092 = vrot.lane.b32.xlu2 %v1088_v29, %s1413_s21  ;;  %v1101_v30 = vrot.slane %v1089_v8, 7 }
0x11d4   :  { %1102 = vrot.lane.b32.xlu1 %v1101_v30, %s1413_s21 }
0x11d5   :  { %v237_v17 = vpop.permute.xlu1 %236  ;;  %v356_v25 = vpop.permute.xlu2 %355 }
0x11d6   :  { %242 = vst.msk [vmem:[#allocation8 + $0x8] sm:$0x1] %vm240_vm8, %v237_v17 }
0x11d7   :  { %362 = vst.msk [vmem:[#allocation8] sm:$0x2] %vm361_vm9, %v356_v25 }
0x11dd   :  { %v478_v26 = vpop.permute.xlu1 %477  ;;  %v480_v31 = vpop.permute.xlu2 %479 }
0x11de   :  { %484 = vst.msk [vmem:[#allocation8] sm:$0x4] %vm483_vm14, %v478_v26 }
0x11df   :  { %485 = vst.msk [vmem:[#allocation8 + $0x8] sm:$0x4] %vm483_vm14, %v480_v31 }
0x11e5   :  { %v603_v32 = vpop.permute.xlu1 %602  ;;  %v724_v33 = vpop.permute.xlu2 %723 }
0x11e6   :  { %608 = vst.msk [vmem:[#allocation8 + $0x8] sm:$0x8] %vm606_vm11, %v603_v32 }
0x11e7   :  { %730 = vst.msk [vmem:[#allocation8] sm:$0x10] %vm729_vm12, %v724_v33 }
0x11ed   :  { %v847_v34 = vpop.permute.xlu1 %846  ;;  %v849_v9 = vpop.permute.xlu2 %848 }
0x11ee   :  { %853 = vst.msk [vmem:[#allocation8] sm:$0x20] %vm852_vm15, %v847_v34 }
0x11ef   :  { %854 = vst.msk [vmem:[#allocation8 + $0x8] sm:$0x20] %vm852_vm15, %v849_v9 }
0x11f5   :  { %v972_v35 = vpop.permute.xlu1 %971 }
0x11f6   :  { %977 = vst.msk [vmem:[#allocation8 + $0x8] sm:$0x40] %vm975_vm13, %v972_v35 }
0x122c   :  { %v1093_v36 = vpop.permute.xlu2 %1092 }
0x122d   :  { %1099 = vst.msk [vmem:[#allocation8] sm:$0x80] %vm1098_vm0, %v1093_v36 }
0x122e   :  { %1105 = vst.msk [vmem:[#allocation9 - $0x7] sm:$0x80] %vm1098_vm0, %v1093_v36 }
0x1244   :  { %v1095_v37 = vpop.permute.xlu0 %1094 }
0x1245   :  { %1100 = vst.msk [vmem:[#allocation8 + $0x8] sm:$0x80] %vm1098_vm0, %v1095_v37 }
0x1246   :  { %v1103_v38 = vpop.permute.xlu1 %1102  ;;  %1119 = dma.vmem_to_hbm [thread:$0]  %s1112_s24, 256, %s1114_s27, [#allocation4], %s1407_s9, %s1407_s9, %s1408_s10  }
0x1247   :  { %1106 = vst.msk [vmem:[#allocation9 + $0x1] sm:$0x1] %vm240_vm8, %v1103_v38 }
0x1248   :  { %1130 = dma.vmem_to_hbm [thread:$0]  %s1126_s29, 32, %s1128_s11, [#allocation10]  }
0x1249   :  { %1402 = dma.done.wait [#allocation4], 256  }
0x124a   :  { %1403 = vsyncadd [#allocation4], 4294967040 }
0x124b   :  { %1404 = dma.done.wait [#allocation10], 32  }
0x124c   :  { %1405 = vsyncadd [#allocation10], 4294967264 }
0x124d   :  { %1139 = vsyncpa [#allocation3], 1 }
0x124e   :  { %1140 = vsyncpa [#allocation6], 1 }
0x124f   :  { %1141 = vsyncpa [#allocation4], 1 }
0x1250   :  { %1142 = vsyncpa [#allocation10], 1 }

</bundles_post_ra>
